<compile_context>
chip_gen: v5e
topology: v5e:2x2
jax: 0.10.0
libtpu: 0.0.40
codegen_flags: <defaults>
</compile_context>

<pallas_src>
import jax
import jax.numpy as jnp
from jax.experimental import pallas as pl
from jax.experimental.pallas import tpu as pltpu


# ----------------------------------------------------------------------------
# Fused RDB kernel
# ----------------------------------------------------------------------------
def make_rdb_kernel(H, W, G0, G, C, PAD):
    Hp, Wp = H + 2, W + 2
    S = Hp * Wp                      # flattened padded spatial size (lane dim)
    Ctot = G0 + C * G                # channels after dense concatenation

    def kernel(*refs):
        # refs = (x, mask, [wT_c, b_c]*C, lff_wT, lff_b, out, feat_scratch)
        x_ref = refs[0]                       # (G0, S)   padded+flattened input
        mask_ref = refs[1]                    # (1, S)    1.0 interior / 0.0 halo
        conv_refs = refs[2:2 + 2 * C]
        lffw_ref = refs[2 + 2 * C]            # (G0, Ctot)
        lffb_ref = refs[3 + 2 * C]            # (G0, 1)
        o_ref = refs[4 + 2 * C]               # (G0, S)
        feat = refs[5 + 2 * C]                # VMEM scratch (Ctot, S + 2*PAD)

        # Zero the scratch once (margins + halos of all channel groups must be zero),
        # then place the input channels into the main region.
        feat[...] = jnp.zeros_like(feat)
        feat[pl.ds(0, G0), pl.ds(PAD, S)] = x_ref[...]
        mask = mask_ref[...]                  # (1, S)

        # Dense conv layers: each reads the first Cin channels, writes its G channels.
        for c in range(C):
            Cin = G0 + c * G
            wT = conv_refs[2 * c][...]        # (G, 9*Cin)
            bias = conv_refs[2 * c + 1][...]  # (G, 1)

            # im2col via 9 static lane-shifted slices of the padded feature buffer.
            cols = []
            for ky in range(3):
                for kx in range(3):
                    d = (ky - 1) * Wp + (kx - 1)
                    cols.append(feat[pl.ds(0, Cin), pl.ds(PAD + d, S)])
            im2col = jnp.concatenate(cols, axis=0)        # (9*Cin, S)

            acc = jnp.dot(wT, im2col, preferred_element_type=jnp.float32)  # (G, S)
            acc = jnp.maximum(acc + bias, 0.0) * mask     # bias + ReLU, zero the halo
            feat[pl.ds(G0 + c * G, G), pl.ds(PAD, S)] = acc

        # LFF 1x1 conv over all Ctot channels + residual add of the original input.
        featall = feat[pl.ds(0, Ctot), pl.ds(PAD, S)]     # (Ctot, S)
        y = jnp.dot(lffw_ref[...], featall, preferred_element_type=jnp.float32)
        y = y + lffb_ref[...] + featall[:G0, :]           # residual = input channels
        o_ref[...] = y.astype(o_ref.dtype)

    return kernel


# ----------------------------------------------------------------------------
# Wrapper: one pallas_call for the whole RDB, NCHW in / NCHW out
# ----------------------------------------------------------------------------
@jax.jit
def rdb_forward_nchw(x_nchw, params):
    """x_nchw: (B, G0, H, W) float32 -> (B, G0, H, W) float32."""
    B, G0, H, W = x_nchw.shape
    convs = params["convs"]
    C = len(convs)
    G = convs[0][1].shape[0]
    Hp, Wp = H + 2, W + 2
    S = Hp * Wp
    Ctot = G0 + C * G
    PAD = 128                         # lane margin (>= Wp+1); multiple of 128 for aligned stores

    # NCHW already has channels on sublanes / spatial on lanes: just pad + flatten spatial.
    xp = jnp.pad(x_nchw, ((0, 0), (0, 0), (1, 1), (1, 1)))     # (B, G0, Hp, Wp)
    x_flat = xp.reshape(B, G0, S)

    # Interior (non-halo) mask over the flattened padded spatial positions.
    py = jnp.arange(Hp)
    px = jnp.arange(Wp)
    m = ((py >= 1) & (py <= H))[:, None] & ((px >= 1) & (px <= W))[None, :]
    mask = m.reshape(1, S).astype(jnp.float32)

    ops = [x_flat, mask]
    in_specs = [
        pl.BlockSpec((None, G0, S), lambda b: (b, 0, 0)),      # per-batch block (squeezed)
        pl.BlockSpec((1, S), lambda b: (0, 0)),
    ]
    # Conv weights reshaped for the transposed im2col matmul: (G, 9*Cin).
    for (w, b) in convs:
        Cin = w.shape[2]
        wT = jnp.transpose(w, (3, 0, 1, 2)).reshape(G, 9 * Cin)
        ops += [wT, b.reshape(G, 1)]
        in_specs += [pl.BlockSpec((G, 9 * Cin), lambda b: (0, 0)),
                     pl.BlockSpec((G, 1), lambda b: (0, 0))]
    # LFF weights transposed: (G0, Ctot).
    lff_wT = params["lff_w"].T
    lff_b2 = params["lff_b"].reshape(G0, 1)
    ops += [lff_wT, lff_b2]
    in_specs += [pl.BlockSpec((G0, Ctot), lambda b: (0, 0)),
                 pl.BlockSpec((G0, 1), lambda b: (0, 0))]

    kernel = make_rdb_kernel(H, W, G0, G, C, PAD)
    out_flat = pl.pallas_call(
        kernel,
        out_shape=jax.ShapeDtypeStruct((B, G0, S), x_nchw.dtype),
        grid=(B,),
        in_specs=in_specs,
        out_specs=pl.BlockSpec((None, G0, S), lambda b: (b, 0, 0)),
        scratch_shapes=[pltpu.VMEM((Ctot, S + 2 * PAD), jnp.float32)],
        compiler_params=pltpu.CompilerParams(
            dimension_semantics=("parallel",)),   # v7x: 2 TCs share the batch axis
    )(*ops)

    # Drop the halo; result is already NCHW.
    return out_flat.reshape(B, G0, Hp, Wp)[:, :, 1:H + 1, 1:W + 1]


# ----------------------------------------------------------------------------
# Parameter init (Conv2d-like shapes, HWIO conv weights) and pure-JAX reference
# ----------------------------------------------------------------------------
def init_rdb_params(key, G0, G, C, kSize=3):
    params = {"convs": []}
    for c in range(C):
        Cin = G0 + c * G
        key, kw, kb = jax.random.split(key, 3)
        fan_in = Cin * kSize * kSize
        scale = 1.0 / jnp.sqrt(jnp.asarray(fan_in, jnp.float32))
        w = jax.random.uniform(kw, (kSize, kSize, Cin, G), jnp.float32, -scale, scale)
        b = jax.random.uniform(kb, (G,), jnp.float32, -scale, scale)
        params["convs"].append((w, b))
    Cin_lff = G0 + C * G
    key, kw, kb = jax.random.split(key, 3)
    scale = 1.0 / jnp.sqrt(jnp.asarray(Cin_lff, jnp.float32))
    params["lff_w"] = jax.random.uniform(kw, (Cin_lff, G0), jnp.float32, -scale, scale)
    params["lff_b"] = jax.random.uniform(kb, (G0,), jnp.float32, -scale, scale)
    return params


def rdb_forward_ref(x_nchw, params):
    x0 = jnp.transpose(x_nchw, (0, 2, 3, 1))
    feat = x0
    for (w, b) in params["convs"]:
        out = jax.lax.conv_general_dilated(
            feat, w, window_strides=(1, 1), padding="SAME",
            dimension_numbers=("NHWC", "HWIO", "NHWC"))
        out = jnp.maximum(out + b, 0.0)
        feat = jnp.concatenate([feat, out], axis=-1)
    y = jnp.einsum("bhwc,cg->bhwg", feat, params["lff_w"]) + params["lff_b"]
    y = y + x0
    return jnp.transpose(y, (0, 3, 1, 2))


if __name__ == "__main__":
    G0, G, C = 8, 8, 3
    B, H, W = 2, 16, 16

    key = jax.random.PRNGKey(0)
    key, kx = jax.random.split(key)
    x = jax.random.normal(kx, (B, G0, H, W), jnp.float32)   # NCHW like PyTorch
    params = init_rdb_params(key, G0, G, C)

    out = rdb_forward_nchw(x, params)
    out = jax.block_until_ready(out)

    ref = rdb_forward_ref(x, params)
    assert out.shape == (B, G0, H, W), out.shape
    assert jnp.allclose(out, ref, atol=1e-4, rtol=1e-4), float(
        jnp.max(jnp.abs(out - ref)))

    print("KERNEL_OK")
</pallas_src>

<mosaic_0001>
module attributes {stable_mosaic.version = 11 : i64} {
  func.func @kernel(%arg0: i32, %arg1: memref<1x8x324xf32, #tpu.memory_space<vmem>>, %arg2: memref<1x324xf32, #tpu.memory_space<vmem>>, %arg3: memref<8x72xf32, #tpu.memory_space<vmem>>, %arg4: memref<8x1xf32, #tpu.memory_space<vmem>>, %arg5: memref<8x144xf32, #tpu.memory_space<vmem>>, %arg6: memref<8x1xf32, #tpu.memory_space<vmem>>, %arg7: memref<8x216xf32, #tpu.memory_space<vmem>>, %arg8: memref<8x1xf32, #tpu.memory_space<vmem>>, %arg9: memref<8x32xf32, #tpu.memory_space<vmem>>, %arg10: memref<8x1xf32, #tpu.memory_space<vmem>>, %arg11: memref<1x8x324xf32, #tpu.memory_space<vmem>>, %arg12: memref<32x580xf32, #tpu.memory_space<vmem>>) attributes {dimension_semantics = [#tpu.dimension_semantics<parallel>], iteration_bounds = array<i64: 2>, scalar_prefetch = 0 : i64, scratch_operands = 1 : i64, tpu.core_type = #tpu.core_type<tc>, window_params = [{transform_indices = @transform_0, window_bounds = array<i64: 1, 8, 324>}, {pipeline_mode = #tpu.pipeline_mode<synchronous>, transform_indices = @transform_1, window_bounds = array<i64: 1, 324>}, {pipeline_mode = #tpu.pipeline_mode<synchronous>, transform_indices = @transform_2, window_bounds = array<i64: 8, 72>}, {pipeline_mode = #tpu.pipeline_mode<synchronous>, transform_indices = @transform_3, window_bounds = array<i64: 8, 1>}, {pipeline_mode = #tpu.pipeline_mode<synchronous>, transform_indices = @transform_4, window_bounds = array<i64: 8, 144>}, {pipeline_mode = #tpu.pipeline_mode<synchronous>, transform_indices = @transform_5, window_bounds = array<i64: 8, 1>}, {pipeline_mode = #tpu.pipeline_mode<synchronous>, transform_indices = @transform_6, window_bounds = array<i64: 8, 216>}, {pipeline_mode = #tpu.pipeline_mode<synchronous>, transform_indices = @transform_7, window_bounds = array<i64: 8, 1>}, {pipeline_mode = #tpu.pipeline_mode<synchronous>, transform_indices = @transform_8, window_bounds = array<i64: 8, 32>}, {pipeline_mode = #tpu.pipeline_mode<synchronous>, transform_indices = @transform_9, window_bounds = array<i64: 8, 1>}, {transform_indices = @transform_10, window_bounds = array<i64: 1, 8, 324>}]} {
    %cst = arith.constant 0.000000e+00 : f32
    %0 = vector.broadcast %cst : f32 to vector<32x580xf32>
    %c0 = arith.constant 0 : index
    %c0_0 = arith.constant 0 : index
    %1 = vector.load %arg12[%c0, %c0_0] : memref<32x580xf32, #tpu.memory_space<vmem>>, vector<32x580xf32>
    tpu.vector_store %arg12[%c0, %c0_0], %0 {strides = array<i32>} : memref<32x580xf32, #tpu.memory_space<vmem>>, vector<32x580xf32>,
    %c0_1 = arith.constant 0 : index
    %c0_2 = arith.constant 0 : index
    %c0_3 = arith.constant 0 : index
    %2 = vector.load %arg1[%c0_1, %c0_2, %c0_3] : memref<1x8x324xf32, #tpu.memory_space<vmem>>, vector<1x8x324xf32>
    %3 = vector.shape_cast %2 : vector<1x8x324xf32> to vector<8x324xf32>
    %c0_4 = arith.constant 0 : index
    %c128 = arith.constant 128 : index
    %4 = vector.load %arg12[%c0_4, %c128] : memref<32x580xf32, #tpu.memory_space<vmem>>, vector<8x324xf32>
    tpu.vector_store %arg12[%c0_4, %c128], %3 {strides = array<i32>} : memref<32x580xf32, #tpu.memory_space<vmem>>, vector<8x324xf32>,
    %c0_5 = arith.constant 0 : index
    %c0_6 = arith.constant 0 : index
    %5 = vector.load %arg2[%c0_5, %c0_6] : memref<1x324xf32, #tpu.memory_space<vmem>>, vector<1x324xf32>
    %c0_7 = arith.constant 0 : index
    %c0_8 = arith.constant 0 : index
    %6 = vector.load %arg3[%c0_7, %c0_8] : memref<8x72xf32, #tpu.memory_space<vmem>>, vector<8x72xf32>
    %c0_9 = arith.constant 0 : index
    %c0_10 = arith.constant 0 : index
    %7 = vector.load %arg4[%c0_9, %c0_10] : memref<8x1xf32, #tpu.memory_space<vmem>>, vector<8x1xf32>
    %c0_11 = arith.constant 0 : index
    %c109 = arith.constant 109 : index
    %8 = vector.load %arg12[%c0_11, %c109] : memref<32x580xf32, #tpu.memory_space<vmem>>, vector<8x324xf32>
    %c0_12 = arith.constant 0 : index
    %c110 = arith.constant 110 : index
    %9 = vector.load %arg12[%c0_12, %c110] : memref<32x580xf32, #tpu.memory_space<vmem>>, vector<8x324xf32>
    %c0_13 = arith.constant 0 : index
    %c111 = arith.constant 111 : index
    %10 = vector.load %arg12[%c0_13, %c111] : memref<32x580xf32, #tpu.memory_space<vmem>>, vector<8x324xf32>
    %c0_14 = arith.constant 0 : index
    %c127 = arith.constant 127 : index
    %11 = vector.load %arg12[%c0_14, %c127] : memref<32x580xf32, #tpu.memory_space<vmem>>, vector<8x324xf32>
    %c0_15 = arith.constant 0 : index
    %c128_16 = arith.constant 128 : index
    %12 = vector.load %arg12[%c0_15, %c128_16] : memref<32x580xf32, #tpu.memory_space<vmem>>, vector<8x324xf32>
    %c0_17 = arith.constant 0 : index
    %c129 = arith.constant 129 : index
    %13 = vector.load %arg12[%c0_17, %c129] : memref<32x580xf32, #tpu.memory_space<vmem>>, vector<8x324xf32>
    %c0_18 = arith.constant 0 : index
    %c145 = arith.constant 145 : index
    %14 = vector.load %arg12[%c0_18, %c145] : memref<32x580xf32, #tpu.memory_space<vmem>>, vector<8x324xf32>
    %c0_19 = arith.constant 0 : index
    %c146 = arith.constant 146 : index
    %15 = vector.load %arg12[%c0_19, %c146] : memref<32x580xf32, #tpu.memory_space<vmem>>, vector<8x324xf32>
    %c0_20 = arith.constant 0 : index
    %c147 = arith.constant 147 : index
    %16 = vector.load %arg12[%c0_20, %c147] : memref<32x580xf32, #tpu.memory_space<vmem>>, vector<8x324xf32>
    %17 = tpu.concatenate %8, %9, %10, %11, %12, %13, %14, %15, %16 in 0 : vector<8x324xf32>, vector<8x324xf32>, vector<8x324xf32>, vector<8x324xf32>, vector<8x324xf32>, vector<8x324xf32>, vector<8x324xf32>, vector<8x324xf32>, vector<8x324xf32> -> vector<72x324xf32>
    %cst_21 = arith.constant dense<0.000000e+00> : vector<8x324xf32>
    %18 = tpu.matmul %6, %17, %cst_21 {dimension_numbers = #tpu.dot_dimension_numbers<[1], [0], [0], [1], [0, 0, 1, 1], [], []>} : vector<8x72xf32>, vector<72x324xf32>, vector<8x324xf32> -> vector<8x324xf32>
    %19 = vector.broadcast %7 : vector<8x1xf32> to vector<8x324xf32>
    %20 = arith.addf %18, %19 : vector<8x324xf32>
    %cst_22 = arith.constant 0.000000e+00 : f32
    %21 = vector.broadcast %cst_22 : f32 to vector<8x324xf32>
    %22 = arith.maximumf %20, %21 : vector<8x324xf32>
    %23 = vector.broadcast %5 : vector<1x324xf32> to vector<8x324xf32>
    %24 = arith.mulf %22, %23 : vector<8x324xf32>
    %c8 = arith.constant 8 : index
    %c128_23 = arith.constant 128 : index
    %25 = vector.load %arg12[%c8, %c128_23] : memref<32x580xf32, #tpu.memory_space<vmem>>, vector<8x324xf32>
    tpu.vector_store %arg12[%c8, %c128_23], %24 {strides = array<i32>} : memref<32x580xf32, #tpu.memory_space<vmem>>, vector<8x324xf32>,
    %c0_24 = arith.constant 0 : index
    %c0_25 = arith.constant 0 : index
    %26 = vector.load %arg5[%c0_24, %c0_25] : memref<8x144xf32, #tpu.memory_space<vmem>>, vector<8x144xf32>
    %c0_26 = arith.constant 0 : index
    %c0_27 = arith.constant 0 : index
    %27 = vector.load %arg6[%c0_26, %c0_27] : memref<8x1xf32, #tpu.memory_space<vmem>>, vector<8x1xf32>
    %c0_28 = arith.constant 0 : index
    %c109_29 = arith.constant 109 : index
    %28 = vector.load %arg12[%c0_28, %c109_29] : memref<32x580xf32, #tpu.memory_space<vmem>>, vector<16x324xf32>
    %c0_30 = arith.constant 0 : index
    %c110_31 = arith.constant 110 : index
    %29 = vector.load %arg12[%c0_30, %c110_31] : memref<32x580xf32, #tpu.memory_space<vmem>>, vector<16x324xf32>
    %c0_32 = arith.constant 0 : index
    %c111_33 = arith.constant 111 : index
    %30 = vector.load %arg12[%c0_32, %c111_33] : memref<32x580xf32, #tpu.memory_space<vmem>>, vector<16x324xf32>
    %c0_34 = arith.constant 0 : index
    %c127_35 = arith.constant 127 : index
    %31 = vector.load %arg12[%c0_34, %c127_35] : memref<32x580xf32, #tpu.memory_space<vmem>>, vector<16x324xf32>
    %c0_36 = arith.constant 0 : index
    %c128_37 = arith.constant 128 : index
    %32 = vector.load %arg12[%c0_36, %c128_37] : memref<32x580xf32, #tpu.memory_space<vmem>>, vector<16x324xf32>
    %c0_38 = arith.constant 0 : index
    %c129_39 = arith.constant 129 : index
    %33 = vector.load %arg12[%c0_38, %c129_39] : memref<32x580xf32, #tpu.memory_space<vmem>>, vector<16x324xf32>
    %c0_40 = arith.constant 0 : index
    %c145_41 = arith.constant 145 : index
    %34 = vector.load %arg12[%c0_40, %c145_41] : memref<32x580xf32, #tpu.memory_space<vmem>>, vector<16x324xf32>
    %c0_42 = arith.constant 0 : index
    %c146_43 = arith.constant 146 : index
    %35 = vector.load %arg12[%c0_42, %c146_43] : memref<32x580xf32, #tpu.memory_space<vmem>>, vector<16x324xf32>
    %c0_44 = arith.constant 0 : index
    %c147_45 = arith.constant 147 : index
    %36 = vector.load %arg12[%c0_44, %c147_45] : memref<32x580xf32, #tpu.memory_space<vmem>>, vector<16x324xf32>
    %37 = tpu.concatenate %28, %29, %30, %31, %32, %33, %34, %35, %36 in 0 : vector<16x324xf32>, vector<16x324xf32>, vector<16x324xf32>, vector<16x324xf32>, vector<16x324xf32>, vector<16x324xf32>, vector<16x324xf32>, vector<16x324xf32>, vector<16x324xf32> -> vector<144x324xf32>
    %cst_46 = arith.constant dense<0.000000e+00> : vector<8x324xf32>
    %38 = tpu.matmul %26, %37, %cst_46 {dimension_numbers = #tpu.dot_dimension_numbers<[1], [0], [0], [1], [0, 0, 1, 1], [], []>} : vector<8x144xf32>, vector<144x324xf32>, vector<8x324xf32> -> vector<8x324xf32>
    %39 = vector.broadcast %27 : vector<8x1xf32> to vector<8x324xf32>
    %40 = arith.addf %38, %39 : vector<8x324xf32>
    %cst_47 = arith.constant 0.000000e+00 : f32
    %41 = vector.broadcast %cst_47 : f32 to vector<8x324xf32>
    %42 = arith.maximumf %40, %41 : vector<8x324xf32>
    %43 = vector.broadcast %5 : vector<1x324xf32> to vector<8x324xf32>
    %44 = arith.mulf %42, %43 : vector<8x324xf32>
    %c16 = arith.constant 16 : index
    %c128_48 = arith.constant 128 : index
    %45 = vector.load %arg12[%c16, %c128_48] : memref<32x580xf32, #tpu.memory_space<vmem>>, vector<8x324xf32>
    tpu.vector_store %arg12[%c16, %c128_48], %44 {strides = array<i32>} : memref<32x580xf32, #tpu.memory_space<vmem>>, vector<8x324xf32>,
    %c0_49 = arith.constant 0 : index
    %c0_50 = arith.constant 0 : index
    %46 = vector.load %arg7[%c0_49, %c0_50] : memref<8x216xf32, #tpu.memory_space<vmem>>, vector<8x216xf32>
    %c0_51 = arith.constant 0 : index
    %c0_52 = arith.constant 0 : index
    %47 = vector.load %arg8[%c0_51, %c0_52] : memref<8x1xf32, #tpu.memory_space<vmem>>, vector<8x1xf32>
    %c0_53 = arith.constant 0 : index
    %c109_54 = arith.constant 109 : index
    %48 = vector.load %arg12[%c0_53, %c109_54] : memref<32x580xf32, #tpu.memory_space<vmem>>, vector<24x324xf32>
    %c0_55 = arith.constant 0 : index
    %c110_56 = arith.constant 110 : index
    %49 = vector.load %arg12[%c0_55, %c110_56] : memref<32x580xf32, #tpu.memory_space<vmem>>, vector<24x324xf32>
    %c0_57 = arith.constant 0 : index
    %c111_58 = arith.constant 111 : index
    %50 = vector.load %arg12[%c0_57, %c111_58] : memref<32x580xf32, #tpu.memory_space<vmem>>, vector<24x324xf32>
    %c0_59 = arith.constant 0 : index
    %c127_60 = arith.constant 127 : index
    %51 = vector.load %arg12[%c0_59, %c127_60] : memref<32x580xf32, #tpu.memory_space<vmem>>, vector<24x324xf32>
    %c0_61 = arith.constant 0 : index
    %c128_62 = arith.constant 128 : index
    %52 = vector.load %arg12[%c0_61, %c128_62] : memref<32x580xf32, #tpu.memory_space<vmem>>, vector<24x324xf32>
    %c0_63 = arith.constant 0 : index
    %c129_64 = arith.constant 129 : index
    %53 = vector.load %arg12[%c0_63, %c129_64] : memref<32x580xf32, #tpu.memory_space<vmem>>, vector<24x324xf32>
    %c0_65 = arith.constant 0 : index
    %c145_66 = arith.constant 145 : index
    %54 = vector.load %arg12[%c0_65, %c145_66] : memref<32x580xf32, #tpu.memory_space<vmem>>, vector<24x324xf32>
    %c0_67 = arith.constant 0 : index
    %c146_68 = arith.constant 146 : index
    %55 = vector.load %arg12[%c0_67, %c146_68] : memref<32x580xf32, #tpu.memory_space<vmem>>, vector<24x324xf32>
    %c0_69 = arith.constant 0 : index
    %c147_70 = arith.constant 147 : index
    %56 = vector.load %arg12[%c0_69, %c147_70] : memref<32x580xf32, #tpu.memory_space<vmem>>, vector<24x324xf32>
    %57 = tpu.concatenate %48, %49, %50, %51, %52, %53, %54, %55, %56 in 0 : vector<24x324xf32>, vector<24x324xf32>, vector<24x324xf32>, vector<24x324xf32>, vector<24x324xf32>, vector<24x324xf32>, vector<24x324xf32>, vector<24x324xf32>, vector<24x324xf32> -> vector<216x324xf32>
    %cst_71 = arith.constant dense<0.000000e+00> : vector<8x324xf32>
    %58 = tpu.matmul %46, %57, %cst_71 {dimension_numbers = #tpu.dot_dimension_numbers<[1], [0], [0], [1], [0, 0, 1, 1], [], []>} : vector<8x216xf32>, vector<216x324xf32>, vector<8x324xf32> -> vector<8x324xf32>
    %59 = vector.broadcast %47 : vector<8x1xf32> to vector<8x324xf32>
    %60 = arith.addf %58, %59 : vector<8x324xf32>
    %cst_72 = arith.constant 0.000000e+00 : f32
    %61 = vector.broadcast %cst_72 : f32 to vector<8x324xf32>
    %62 = arith.maximumf %60, %61 : vector<8x324xf32>
    %63 = vector.broadcast %5 : vector<1x324xf32> to vector<8x324xf32>
    %64 = arith.mulf %62, %63 : vector<8x324xf32>
    %c24 = arith.constant 24 : index
    %c128_73 = arith.constant 128 : index
    %65 = vector.load %arg12[%c24, %c128_73] : memref<32x580xf32, #tpu.memory_space<vmem>>, vector<8x324xf32>
    tpu.vector_store %arg12[%c24, %c128_73], %64 {strides = array<i32>} : memref<32x580xf32, #tpu.memory_space<vmem>>, vector<8x324xf32>,
    %c0_74 = arith.constant 0 : index
    %c128_75 = arith.constant 128 : index
    %66 = vector.load %arg12[%c0_74, %c128_75] : memref<32x580xf32, #tpu.memory_space<vmem>>, vector<32x324xf32>
    %c0_76 = arith.constant 0 : index
    %c0_77 = arith.constant 0 : index
    %67 = vector.load %arg9[%c0_76, %c0_77] : memref<8x32xf32, #tpu.memory_space<vmem>>, vector<8x32xf32>
    %cst_78 = arith.constant dense<0.000000e+00> : vector<8x324xf32>
    %68 = tpu.matmul %67, %66, %cst_78 {dimension_numbers = #tpu.dot_dimension_numbers<[1], [0], [0], [1], [0, 0, 1, 1], [], []>} : vector<8x32xf32>, vector<32x324xf32>, vector<8x324xf32> -> vector<8x324xf32>
    %c0_79 = arith.constant 0 : index
    %c0_80 = arith.constant 0 : index
    %69 = vector.load %arg10[%c0_79, %c0_80] : memref<8x1xf32, #tpu.memory_space<vmem>>, vector<8x1xf32>
    %70 = vector.broadcast %69 : vector<8x1xf32> to vector<8x324xf32>
    %71 = arith.addf %68, %70 : vector<8x324xf32>
    %72 = vector.extract_strided_slice %66 {offsets = [0, 0], sizes = [8, 324], strides = [1, 1]} : vector<32x324xf32> to vector<8x324xf32>
    %73 = arith.addf %71, %72 : vector<8x324xf32>
    %c0_81 = arith.constant 0 : index
    %c0_82 = arith.constant 0 : index
    %c0_83 = arith.constant 0 : index
    %74 = vector.load %arg11[%c0_81, %c0_82, %c0_83] : memref<1x8x324xf32, #tpu.memory_space<vmem>>, vector<1x8x324xf32>
    %75 = vector.shape_cast %74 : vector<1x8x324xf32> to vector<8x324xf32>
    %76 = vector.shape_cast %73 : vector<8x324xf32> to vector<1x8x324xf32>
    tpu.vector_store %arg11[%c0_81, %c0_82, %c0_83], %76 {strides = array<i32>} : memref<1x8x324xf32, #tpu.memory_space<vmem>>, vector<1x8x324xf32>,
    return
  }
  func.func @transform_0(%arg0: i32) -> (i32, i32, i32) {
    %c0_i32 = arith.constant 0 : i32
    %c0_i32_0 = arith.constant 0 : i32
    %c0_i32_1 = arith.constant 0 : i32
    return %arg0, %c0_i32, %c0_i32_0 : i32, i32, i32
  }
  func.func @transform_1(%arg0: i32) -> (i32, i32) {
    %c0_i32 = arith.constant 0 : i32
    %c0_i32_0 = arith.constant 0 : i32
    %c0_i32_1 = arith.constant 0 : i32
    return %c0_i32, %c0_i32_0 : i32, i32
  }
  func.func @transform_2(%arg0: i32) -> (i32, i32) {
    %c0_i32 = arith.constant 0 : i32
    %c0_i32_0 = arith.constant 0 : i32
    %c0_i32_1 = arith.constant 0 : i32
    return %c0_i32, %c0_i32_0 : i32, i32
  }
  func.func @transform_3(%arg0: i32) -> (i32, i32) {
    %c0_i32 = arith.constant 0 : i32
    %c0_i32_0 = arith.constant 0 : i32
    %c0_i32_1 = arith.constant 0 : i32
    return %c0_i32, %c0_i32_0 : i32, i32
  }
  func.func @transform_4(%arg0: i32) -> (i32, i32) {
    %c0_i32 = arith.constant 0 : i32
    %c0_i32_0 = arith.constant 0 : i32
    %c0_i32_1 = arith.constant 0 : i32
    return %c0_i32, %c0_i32_0 : i32, i32
  }
  func.func @transform_5(%arg0: i32) -> (i32, i32) {
    %c0_i32 = arith.constant 0 : i32
    %c0_i32_0 = arith.constant 0 : i32
    %c0_i32_1 = arith.constant 0 : i32
    return %c0_i32, %c0_i32_0 : i32, i32
  }
  func.func @transform_6(%arg0: i32) -> (i32, i32) {
    %c0_i32 = arith.constant 0 : i32
    %c0_i32_0 = arith.constant 0 : i32
    %c0_i32_1 = arith.constant 0 : i32
    return %c0_i32, %c0_i32_0 : i32, i32
  }
  func.func @transform_7(%arg0: i32) -> (i32, i32) {
    %c0_i32 = arith.constant 0 : i32
    %c0_i32_0 = arith.constant 0 : i32
    %c0_i32_1 = arith.constant 0 : i32
    return %c0_i32, %c0_i32_0 : i32, i32
  }
  func.func @transform_8(%arg0: i32) -> (i32, i32) {
    %c0_i32 = arith.constant 0 : i32
    %c0_i32_0 = arith.constant 0 : i32
    %c0_i32_1 = arith.constant 0 : i32
    return %c0_i32, %c0_i32_0 : i32, i32
  }
  func.func @transform_9(%arg0: i32) -> (i32, i32) {
    %c0_i32 = arith.constant 0 : i32
    %c0_i32_0 = arith.constant 0 : i32
    %c0_i32_1 = arith.constant 0 : i32
    return %c0_i32, %c0_i32_0 : i32, i32
  }
  func.func @transform_10(%arg0: i32) -> (i32, i32, i32) {
    %c0_i32 = arith.constant 0 : i32
    %c0_i32_0 = arith.constant 0 : i32
    %c0_i32_1 = arith.constant 0 : i32
    return %arg0, %c0_i32, %c0_i32_0 : i32, i32, i32
  }
}

</mosaic_0001>

<bundles_post_ra>
// kernel: rdb_forward_nchw.1
= control target key start
LH: loop header
LB: loop body
LE: loop exit
PB: predicated region body
PF: predicated region fallthrough
CT: control target
= control target key end

     0   :  { %s3213_s13 = smov 0   ;;  %s4826_s0 = inlined_call_operand.vmem [shape: f32[2,8,324], index: 0, kind: input, shape index: {}]   ;;  %s4827_s1 = inlined_call_operand.vmem [shape: f32[1,324], index: 1, kind: input, shape index: {}]   ;;  %s4828_s2 = inlined_call_operand.vmem [shape: f32[8,72], index: 2, kind: input, shape index: {}]   ;;  %s4829_s3 = inlined_call_operand.vmem [shape: f32[8,1], index: 3, kind: input, shape index: {}]   ;;  %s4830_s4 = inlined_call_operand.vmem [shape: f32[8,144], index: 4, kind: input, shape index: {}]   ;;  %s4831_s5 = inlined_call_operand.vmem [shape: f32[8,1], index: 5, kind: input, shape index: {}]   ;;  %s4832_s6 = inlined_call_operand.vmem [shape: f32[8,216], index: 6, kind: input, shape index: {}]   ;;  %s4833_s7 = inlined_call_operand.vmem [shape: f32[8,1], index: 7, kind: input, shape index: {}]   ;;  %s4834_s8 = inlined_call_operand.vmem [shape: f32[8,32], index: 8, kind: input, shape index: {}]   ;;  %s4835_s9 = inlined_call_operand.vmem [shape: f32[8,1], index: 9, kind: input, shape index: {}]   ;;  %s4836_s10 = inlined_call_operand.vmem [shape: f32[2,8,324], index: 10, kind: output, shape index: {}]  }
   0x1 LB: > { %s2152_s14 = sadd.s32 4294967295, %s3145_s13   ;;  %p2156_p0 = scmp.ge.s32.totalorder %s3145_s13, 1  ;;  %s3145_s13 = sphi %s3213_s13, %s20_s13  }
   0x2   : > { %p312_p1 = scmp.lt.s32.totalorder %s3145_s13, 3 }
   0x4   : > { %p313_p2 = pnand %p2156_p0, %p312_p1 }
   0x6   : > { %316 = sbr.rel (%p313_p2) target bundleno = 1736 (0x6c8), region = 60 }
   0xb   : > { %p350_p3 = scmp.lt.s32.totalorder %s2152_s14, 1  ;;  %v3147_v0 = vmov 0.0   ;;  %vm364_vm0 = vcmask 556032   ;;  %s3148_s19 = smov 126   ;;  %v389_v9 = vld [vmem:[%s4829_s3] sm:$0xff]  ;;  %v3157_v10 = vmov 0  }
   0xc   : > { %360 = vst [vmem:[#allocation2] sm:$0xff] %v3147_v0  ;;  %s3149_s20 = smov 127   ;;  %s3150_s21 = smov 110   ;;  %2273 = vset.pattern.permute.xlu1 %v3157_v10  ;;  %2419 = vset.pattern.permute.xlu2 %v3157_v10  ;;  %vm418_vm1 = vcmask 1031168   ;;  %vm406_vm2 = vcmask 1039360   ;;  %vm430_vm3 = vcmask 900096  }
   0xd   : > { %s4925_s14 = smov (!%p350_p3, %s2152_s14), 1  ;;  %363 = vst [vmem:[#allocation2 + $0x18] sm:$0xff] %v3147_v0  ;;  %s3151_s22 = smov 109   ;;  %3130 = vset.pattern.permute.xlu0 %v3157_v10  ;;  %vm449_vm4 = vcmask 883712   ;;  %vm440_vm5 = vcmask 891904   ;;  %vm458_vm6 = vcmask 752640  }
   0xe   : > { %s2173_s15 = smul.u32 24, %s4925_s14  ;;  %369 = vst [vmem:[#allocation2 + $0x40] sm:$0xff] %v3147_v0  ;;  %s3152_s23 = smov 108   ;;  %vm476_vm7 = vcmask 736256   ;;  %vm467_vm8 = vcmask 744448   ;;  %vm556_vm9 = vcmask 154624  }
   0xf   : > { %374 = vst [vmem:[#allocation2 + $0x68] sm:$0xff] %v3147_v0  ;;  %s3153_s24 = smov 92   ;;  %s3154_s25 = smov 91   ;;  %vm611_vm10 = vcmask 588800   ;;  %vm1113_vm11 = vcmask 130048   ;;  %vm1875_vm12 = vcmask 719872  }
  0x10   : > { %s354_s18 = scalar_lea.vmem %s4826_s0, %s2173_s15  ;;  %379 = vst [vmem:[#allocation2 + $0x90] sm:$0xff] %v3147_v0  ;;  %s3155_s26 = smov 90   ;;  %vm2027_vm13 = vcmask 261120  }
  0x11   : > { %v3232_v1 = vld [vmem:[%s354_s18] sm:$0xff]  ;;  %v383_v3 = vld [vmem:[%s354_s18 + $0x10] sm:$0xff]  ;;  %v382_v4 = vld [vmem:[%s354_s18 + $0x8] sm:$0xff]  ;;  %s3156_s27 = smov 19   ;;  %s359_s18 = scalar_lea.vmem %s4836_s10, %s2173_s15 }
  0x12   : > { %384 = vst [vmem:[#allocation2 + $0x8] sm:$0xff] %v3232_v1  ;;  %v3238_v2 = vpack.i.bf16 %v3232_v1, %v3147_v0  ;;  %v2223_v7 = vpack.i.bf16 %v382_v4, %v3232_v1 }
  0x13   : > { %385 = vst [vmem:[#allocation2 + $0x10] sm:$0xff] %v382_v4 }
  0x14   : > { %2204 = vrot.lane.b32.xlu1 %v3238_v2, %s3148_s19  ;;  %2194 = vrot.lane.b32.xlu0 %v3238_v2, %s3149_s20  ;;  %386 = vst.msk [vmem:[#allocation2 + $0x18] sm:$0xff] %vm364_vm0, %v383_v3 }
  0x15   : > { %2214 = vrot.lane.b32.xlu2 %v3238_v2, %s3150_s21 }
  0x1b   : > { %v393_v5 = vld [vmem:[#allocation2 + $0x18] sm:$0xff] }
  0x1c   : > { %v3248_v6 = vpack.i.bf16 %v393_v5, %v382_v4  ;;  %v2228_v8 = vpack.i.bf16 %v3232_v1, %v393_v5 }
  0x1e   : > { %2209 = vrot.lane.b32.xlu1 %v3248_v6, %s3148_s19  ;;  %2199 = vrot.lane.b32.xlu0 %v3248_v6, %s3149_s20 }
  0x1f   : > { %2219 = vrot.lane.b32.xlu2 %v3248_v6, %s3150_s21 }
  0x26   : > { %2224 = vrot.lane.b32.xlu0 %v2223_v7, %s3151_s22  ;;  %2229 = vrot.lane.b32.xlu1 %v2228_v8, %s3151_s22 }
  0x27   : > { %2234 = vrot.lane.b32.xlu2 %v2223_v7, %s3152_s23 }
  0x2e   : > { %2239 = vrot.lane.b32.xlu0 %v2228_v8, %s3152_s23  ;;  %2244 = vrot.lane.b32.xlu1 %v2223_v7, %s3153_s24 }
  0x2f   : > { %2249 = vrot.lane.b32.xlu2 %v2228_v8, %s3153_s24 }
  0x36   : > { %2254 = vrot.lane.b32.xlu0 %v2223_v7, %s3154_s25  ;;  %2259 = vrot.lane.b32.xlu1 %v2228_v8, %s3154_s25 }
  0x37   : > { %2264 = vrot.lane.b32.xlu2 %v2223_v7, %s3155_s26 }
  0x3e   : > { %2269 = vrot.lane.b32.xlu0 %v2228_v8, %s3155_s26  ;;  %481 = vperm.xlu1 %2273, %v389_v9  }
  0x3f   : > { %2275 = vrot.lane.b32.xlu2 %v3238_v2, %s3156_s27 }
  0x46   : > { %2280 = vrot.lane.b32.xlu0 %v3248_v6, %s3156_s27 }
  0x6f   : > { %v2215_v11 = vpop.permute.xlu2 %2214 }
  0x70   : > { %v2217_v34 = vunpack.i.h.bf16 %v2215_v11  ;;  %v2216_v35 = vunpack.i.l.bf16 %v2215_v11 }
  0x72   : > { %v431_v41 = vsel %vm430_vm3, %v2216_v35, %v2217_v34 }
  0x79   : > { %v2220_v14 = vpop.permute.xlu2 %2219 }
  0x7a   : > { %v2222_v24 = vunpack.i.h.bf16 %v2220_v14  ;;  %v2221_v36 = vunpack.i.l.bf16 %v2220_v14 }
  0x7c   : > { %v433_v38 = vsel %vm430_vm3, %v2221_v36, %v2222_v24  ;;  %v432_v42 = vsel %vm430_vm3, %v2217_v34, %v2221_v36 }
  0x7d   : > { %v2309_v43 = vpack.i.bf16 %v2222_v24, %v433_v38  ;;  %v2304_v50 = vpack.i.bf16 %v432_v42, %v431_v41 }
  0x81   : > { %v2235_v33 = vpop.permute.xlu2 %2234 }
  0x82   : > { %v2237_v46 = vunpack.i.h.bf16 %v2235_v33  ;;  %v2236_v47 = vunpack.i.l.bf16 %v2235_v33 }
  0x84   : > { %v450_v53 = vsel %vm449_vm4, %v2236_v47, %v2237_v46 }
  0x85   : > { %v2324_v58 = vpack.i.bf16 %v450_v53, %v2236_v47 }
  0x86   : > { %v2205_v12 = vpop.permute.xlu1 %2204  ;;  %v2195_v13 = vpop.permute.xlu0 %2194 }
  0x87   : > { %v2207_v15 = vunpack.i.h.bf16 %v2205_v12  ;;  %v2206_v16 = vunpack.i.l.bf16 %v2205_v12  ;;  %v2197_v17 = vunpack.i.h.bf16 %v2195_v13  ;;  %v2196_v18 = vunpack.i.l.bf16 %v2195_v13 }
  0x89   : > { %v419_v25 = vsel %vm418_vm1, %v2206_v16, %v2207_v15  ;;  %v407_v28 = vsel %vm406_vm2, %v2196_v18, %v2197_v17  ;;  %v3292_v52 = vpop.permute.xlu2 %2249 }
  0x8a   : > { %v2251_v61 = vunpack.i.l.bf16 %v3292_v52 }
  0x90   : > { %v2210_v19 = vpop.permute.xlu1 %2209  ;;  %v2200_v20 = vpop.permute.xlu0 %2199 }
  0x91   : > { %v2211_v21 = vunpack.i.l.bf16 %v2210_v19  ;;  %v2202_v22 = vunpack.i.h.bf16 %v2200_v20  ;;  %v2201_v23 = vunpack.i.l.bf16 %v2200_v20  ;;  %v2212_v37 = vunpack.i.h.bf16 %v2210_v19  ;;  %v2265_v7 = vpop.permute.xlu2 %2264 }
  0x92   : > { %v2267_v14 = vunpack.i.h.bf16 %v2265_v7 }
  0x93   : > { %v420_v26 = vsel %vm418_vm1, %v2207_v15, %v2211_v21  ;;  %v409_v27 = vsel %vm406_vm2, %v2201_v23, %v2202_v22  ;;  %v408_v29 = vsel %vm406_vm2, %v2197_v17, %v2201_v23  ;;  %v421_v44 = vsel %vm418_vm1, %v2211_v21, %v2212_v37 }
  0x94   : > { %v2294_v30 = vpack.i.bf16 %v420_v26, %v419_v25  ;;  %v2289_v31 = vpack.i.bf16 %v2202_v22, %v409_v27  ;;  %v2284_v32 = vpack.i.bf16 %v408_v29, %v407_v28  ;;  %v2299_v51 = vpack.i.bf16 %v2212_v37, %v421_v44 }
  0x95   : > { %v2266_v15 = vunpack.i.l.bf16 %v2265_v7 }
  0x96   : > { %2295 = vrot.lane.b32.xlu0 %v2294_v30, %s3156_s27  ;;  %2290 = vrot.lane.b32.xlu2 %v2289_v31, %s3156_s27 }
  0x97   : > { %2285 = vrot.lane.b32.xlu1 %v2284_v32, %s3156_s27  ;;  %v477_v19 = vsel %vm476_vm7, %v2266_v15, %v2267_v14 }
  0x98   : > { %v2225_v39 = vpop.permute.xlu0 %2224  ;;  %v3284_v40 = vpop.permute.xlu1 %2229  ;;  %v2354_v22 = vpack.i.bf16 %v477_v19, %v2266_v15 }
  0x99   : > { %v2227_v45 = vunpack.i.h.bf16 %v2225_v39  ;;  %v2231_v48 = vunpack.i.l.bf16 %v3284_v40  ;;  %v2226_v49 = vunpack.i.l.bf16 %v2225_v39  ;;  %v3349_v29 = vpop.permute.xlu2 %2275 }
  0x9b   : > { %v442_v54 = vsel %vm440_vm5, %v2227_v45, %v2231_v48  ;;  %v441_v56 = vsel %vm440_vm5, %v2226_v49, %v2227_v45 }
  0x9c   : > { %v2319_v59 = vpack.i.bf16 %v2231_v48, %v442_v54  ;;  %v2314_v60 = vpack.i.bf16 %v441_v56, %v2226_v49 }
  0x9e   : > { %2310 = vrot.lane.b32.xlu0 %v2309_v43, %s3156_s27  ;;  %2305 = vrot.lane.b32.xlu2 %v2304_v50, %s3156_s27 }
  0x9f   : > { %2300 = vrot.lane.b32.xlu1 %v2299_v51, %s3156_s27 }
  0xa0   : > { %v3297_v55 = vpop.permute.xlu0 %2239  ;;  %v2245_v57 = vpop.permute.xlu1 %2244 }
  0xa1   : > { %v2247_v62 = vunpack.i.h.bf16 %v2245_v57  ;;  %v2246_v63 = vunpack.i.l.bf16 %v2245_v57  ;;  %v2241_v3 = vunpack.i.l.bf16 %v3297_v55 }
  0xa3   : > { %v460_v4 = vsel %vm458_vm6, %v2247_v62, %v2251_v61  ;;  %v459_v5 = vsel %vm458_vm6, %v2246_v63, %v2247_v62  ;;  %v451_v12 = vsel %vm449_vm4, %v2237_v46, %v2241_v3 }
  0xa4   : > { %v2339_v10 = vpack.i.bf16 %v2251_v61, %v460_v4  ;;  %v2334_v11 = vpack.i.bf16 %v459_v5, %v2246_v63  ;;  %v2329_v18 = vpack.i.bf16 %v2241_v3, %v451_v12  ;;  %v2277_v4 = vunpack.i.l.bf16 %v3349_v29 }
  0xa6   : > { %2325 = vrot.lane.b32.xlu0 %v2324_v58, %s3156_s27  ;;  %2320 = vrot.lane.b32.xlu2 %v2319_v59, %s3156_s27 }
  0xa7   : > { %2315 = vrot.lane.b32.xlu1 %v2314_v60, %s3156_s27 }
  0xa8   : > { %v3307_v8 = vpop.permute.xlu1 %2259  ;;  %v2255_v9 = vpop.permute.xlu0 %2254 }
  0xa9   : > { %v2257_v13 = vunpack.i.h.bf16 %v2255_v9  ;;  %v2261_v16 = vunpack.i.l.bf16 %v3307_v8  ;;  %v2256_v17 = vunpack.i.l.bf16 %v2255_v9 }
  0xab   : > { %v469_v20 = vsel %vm467_vm8, %v2257_v13, %v2261_v16  ;;  %v468_v21 = vsel %vm467_vm8, %v2256_v17, %v2257_v13 }
  0xac   : > { %v2349_v23 = vpack.i.bf16 %v2261_v16, %v469_v20  ;;  %v2344_v25 = vpack.i.bf16 %v468_v21, %v2256_v17 }
  0xae   : > { %2340 = vrot.lane.b32.xlu0 %v2339_v10, %s3156_s27  ;;  %2335 = vrot.lane.b32.xlu2 %v2334_v11, %s3156_s27 }
  0xaf   : > { %2330 = vrot.lane.b32.xlu1 %v2329_v18, %s3156_s27 }
  0xb0   : > { %v3317_v24 = vpop.permute.xlu0 %2269  ;;  %v3359_v32 = vpop.permute.xlu1 %481 }
  0xb1   : > { %v2271_v26 = vunpack.i.l.bf16 %v3317_v24 }
  0xb3   : > { %v478_v27 = vsel %vm476_vm7, %v2267_v14, %v2271_v26 }
  0xb4   : > { %v2359_v28 = vpack.i.bf16 %v2271_v26, %v478_v27 }
  0xb6   : > { %2355 = vrot.lane.b32.xlu0 %v2354_v22, %s3156_s27  ;;  %2350 = vrot.lane.b32.xlu2 %v2349_v23, %s3156_s27 }
  0xb7   : > { %2345 = vrot.lane.b32.xlu1 %v2344_v25, %s3156_s27 }
  0xb8   : > { %v3357_v31 = vpop.permute.xlu0 %2280 }
  0xbe   : > { %2370 = vrot.lane.b32.xlu0 %v3248_v6, %s3149_s20  ;;  %2365 = vrot.lane.b32.xlu2 %v3238_v2, %s3149_s20 }
  0xbf   : > { %2360 = vrot.lane.b32.xlu1 %v2359_v28, %s3156_s27 }
  0xc6   : > { %2375 = vrot.lane.b32.xlu0 %v3238_v2, %s3148_s19  ;;  %2390 = vrot.lane.b32.xlu2 %v3248_v6, %s3150_s21 }
  0xc7   : > { %2380 = vrot.lane.b32.xlu1 %v3248_v6, %s3148_s19 }
  0xce   : > { %2395 = vrot.lane.b32.xlu2 %v3248_v6, %s3151_s22  ;;  %2421 = vrot.lane.b32.xlu0 %v3238_v2, %s3156_s27 }
  0xcf   : > { %2385 = vrot.lane.b32.xlu1 %v3238_v2, %s3150_s21 }
  0xd6   : > { %2400 = vrot.lane.b32.xlu2 %v3248_v6, %s3152_s23 }
  0xd7   : > { %2426 = vrot.lane.b32.xlu1 %v3248_v6, %s3156_s27 }
  0xde   : > { %2405 = vrot.lane.b32.xlu2 %v3248_v6, %s3153_s24 }
  0xe6   : > { %2410 = vrot.lane.b32.xlu2 %v3248_v6, %s3154_s25 }
  0xee   : > { %2415 = vrot.lane.b32.xlu2 %v3248_v6, %s3155_s26  ;;  %v693_v6 = vld [vmem:[%s4831_s5] sm:$0xff] }
  0xf0   : > { %v3353_v30 = vpop.permute.xlu2 %2290 }
  0xf6   : > { %858 = vperm.xlu2 %2419, %v693_v6  }
  0xf8   : > { %v3355_v2 = vpop.permute.xlu2 %2305 }
  0xf9   : > { %v2308_v5 = vunpack.i.h.bf16 %v3355_v2  ;;  %v2307_v7 = vunpack.i.l.bf16 %v3355_v2 }
 0x100   : > { %v3361_v33 = vpop.permute.xlu2 %2320 }
 0x108   : > { %v3363_v34 = vpop.permute.xlu0 %2295  ;;  %v3365_v35 = vpop.permute.xlu2 %2335 }
 0x109   : > { %v3367_v36 = vpop.permute.xlu1 %2285  ;;  %v2338_v54 = vunpack.i.h.bf16 %v3365_v35  ;;  %v2337_v56 = vunpack.i.l.bf16 %v3365_v35  ;;  %v2298_v10 = vunpack.i.h.bf16 %v3363_v34  ;;  %v2297_v11 = vunpack.i.l.bf16 %v3363_v34 }
 0x10b   : > { %v575_v9 = vsel %vm556_vm9, %v2337_v56, %v2338_v54  ;;  %v2287_v56 = vunpack.i.l.bf16 %v3367_v36 }
 0x110   : > { %v3372_v37 = vpop.permute.xlu0 %2310  ;;  %v3376_v39 = vpop.permute.xlu2 %2350 }
 0x111   : > { %v3374_v38 = vpop.permute.xlu1 %2300  ;;  %v2353_v12 = vunpack.i.h.bf16 %v3376_v39  ;;  %v2352_v13 = vunpack.i.l.bf16 %v3376_v39 }
 0x118   : > { %v3378_v41 = vpop.permute.xlu0 %2325  ;;  %v2366_v43 = vpop.permute.xlu2 %2365 }
 0x119   : > { %v3380_v42 = vpop.permute.xlu1 %2315  ;;  %v2328_v58 = vunpack.i.h.bf16 %v3378_v41  ;;  %v2327_v59 = vunpack.i.l.bf16 %v3378_v41  ;;  %v2368_v60 = vunpack.i.h.bf16 %v2366_v43  ;;  %v2367_v61 = vunpack.i.l.bf16 %v2366_v43 }
 0x11a   : > { %v2318_v63 = vunpack.i.h.bf16 %v3380_v42  ;;  %v2317_v3 = vunpack.i.l.bf16 %v3380_v42 }
 0x11b   : > { %v572_v19 = vsel %vm556_vm9, %v2327_v59, %v2328_v58  ;;  %v726_v20 = vsel %vm406_vm2, %v2367_v61, %v2368_v60  ;;  %v2323_v61 = vunpack.i.h.bf16 %v3361_v33 }
 0x11c   : > { %v569_v25 = vsel %vm556_vm9, %v2317_v3, %v2318_v63 }
 0x120   : > { %v3382_v44 = vpop.permute.xlu0 %2340  ;;  %v3386_v46 = vpop.permute.xlu2 %2390 }
 0x121   : > { %v3384_v45 = vpop.permute.xlu1 %2330  ;;  %v2342_v21 = vunpack.i.l.bf16 %v3382_v44  ;;  %v2393_v26 = vunpack.i.h.bf16 %v3386_v46  ;;  %v2392_v27 = vunpack.i.l.bf16 %v3386_v46 }
 0x122   : > { %v2332_v59 = vunpack.i.l.bf16 %v3384_v45 }
 0x128   : > { %v2356_v47 = vpop.permute.xlu0 %2355  ;;  %v3406_v14 = vpop.permute.xlu2 %2395 }
 0x129   : > { %v2358_v48 = vunpack.i.h.bf16 %v2356_v47  ;;  %v2357_v49 = vunpack.i.l.bf16 %v2356_v47  ;;  %v2346_v50 = vpop.permute.xlu1 %2345  ;;  %v2397_v42 = vunpack.i.l.bf16 %v3406_v14 }
 0x12a   : > { %v2348_v51 = vunpack.i.h.bf16 %v2346_v50  ;;  %v2347_v53 = vunpack.i.l.bf16 %v2346_v50  ;;  %v2278_v50 = vunpack.i.h.bf16 %v3349_v29 }
 0x12b   : > { %v581_v57 = vsel %vm556_vm9, %v2357_v49, %v2358_v48 }
 0x12c   : > { %622 = vmatpush.msra.mxu0 %v581_v57  ;;  %v578_v62 = vsel %vm556_vm9, %v2347_v53, %v2348_v51  ;;  %v2288_v53 = vunpack.i.h.bf16 %v3367_v36  ;;  %v2343_v57 = vunpack.i.h.bf16 %v3382_v44  ;;  %v580_v44 = vsel %vm556_vm9, %v2352_v13, %v2353_v12 }
 0x12d   : > { %v557_v3 = vsel %vm556_vm9, %v2277_v4, %v2278_v50 }
 0x12e   : > { %623 = vmatpush.msra.mxu0 %v578_v62  ;;  %v2333_v62 = vunpack.i.h.bf16 %v3384_v45  ;;  %v576_v45 = vsel %vm556_vm9, %v2338_v54, %v2342_v21  ;;  %v560_v4 = vsel %vm556_vm9, %v2287_v56, %v2288_v53  ;;  %v2232_v56 = vunpack.i.h.bf16 %v3284_v40 }
 0x130   : > { %v2371_v15 = vpop.permute.xlu0 %2370  ;;  %624 = vmatpush.msra.mxu0 %v575_v9  ;;  %v2322_v9 = vunpack.i.l.bf16 %v3361_v33  ;;  %v577_v33 = vsel %vm556_vm9, %v2342_v21, %v2343_v57  ;;  %v3454_v35 = vpop.permute.xlu2 %2400  ;;  %v2282_v57 = vunpack.i.l.bf16 %v3357_v31 }
 0x131   : > { %v2373_v16 = vunpack.i.h.bf16 %v2371_v15  ;;  %v2372_v17 = vunpack.i.l.bf16 %v2371_v15  ;;  %v2361_v18 = vpop.permute.xlu1 %2360  ;;  %v2402_v46 = vunpack.i.l.bf16 %v3454_v35 }
 0x132   : > { %v2363_v22 = vunpack.i.h.bf16 %v2361_v18  ;;  %v2362_v23 = vunpack.i.l.bf16 %v2361_v18  ;;  %625 = vmatpush.msra.mxu0 %v572_v19  ;;  %v573_v18 = vsel %vm556_vm9, %v2328_v58, %v2332_v59  ;;  %v574_v19 = vsel %vm556_vm9, %v2332_v59, %v2333_v62 }
 0x133   : > { %v728_v28 = vsel %vm406_vm2, %v2372_v17, %v2373_v16  ;;  %v727_v6 = vsel %vm406_vm2, %v2368_v60, %v2372_v17  ;;  %v579_v60 = vsel %vm556_vm9, %v2348_v51, %v2352_v13  ;;  %v563_v51 = vsel %vm556_vm9, %v2297_v11, %v2298_v10 }
 0x134   : > { %626 = vmatpush.msra.mxu0 %v569_v25  ;;  %v582_v39 = vsel %vm556_vm9, %v2358_v48, %v2362_v23  ;;  %v583_v43 = vsel %vm556_vm9, %v2362_v23, %v2363_v22  ;;  %v2435_v47 = vpack.i.bf16 %v2373_v16, %v728_v28  ;;  %v2430_v49 = vpack.i.bf16 %v727_v6, %v726_v20  ;;  %v388_v20 = vld [vmem:[%s4828_s2] sm:$0xff] }
 0x135   : > { %642 = vmatpush.msra.mxu1 %v582_v39  ;;  %662 = vmatpush.msra.mxu2 %v583_v43  ;;  %v566_v48 = vsel %vm556_vm9, %v2307_v7, %v2308_v5  ;;  %v772_v7 = vsel %vm430_vm3, %v2392_v27, %v2393_v26  ;;  %v2312_v11 = vunpack.i.l.bf16 %v3372_v37  ;;  %v2313_v23 = vunpack.i.h.bf16 %v3372_v37 }
 0x136   : > { %2436 = vrot.lane.b32.xlu2 %v2435_v47, %s3156_s27  ;;  %2431 = vrot.lane.b32.xlu1 %v2430_v49, %s3156_s27  ;;  %v2455_v21 = vpack.i.bf16 %v2393_v26, %v772_v7  ;;  %v570_v41 = vsel %vm556_vm9, %v2318_v63, %v2322_v9  ;;  %v2302_v28 = vunpack.i.l.bf16 %v3374_v38  ;;  %v571_v6 = vsel %vm556_vm9, %v2322_v9, %v2323_v61 }
 0x137   : > { %627 = vmatpush.msra.mxu0 %v566_v48  ;;  %643 = vmatpush.msra.mxu1 %v579_v60  ;;  %v2303_v43 = vunpack.i.h.bf16 %v3374_v38  ;;  %v2398_v37 = vunpack.i.h.bf16 %v3406_v14  ;;  %v567_v63 = vsel %vm556_vm9, %v2308_v5, %v2312_v11  ;;  %v2293_v47 = vunpack.i.h.bf16 %v3353_v30 }
 0x138   : > { %663 = vmatpush.msra.mxu2 %v580_v44  ;;  %v2376_v15 = vpop.permute.xlu0 %2375  ;;  %v2292_v49 = vunpack.i.l.bf16 %v3353_v30  ;;  %v568_v38 = vsel %vm556_vm9, %v2312_v11, %v2313_v23  ;;  %v2283_v14 = vunpack.i.h.bf16 %v3357_v31  ;;  %v564_v2 = vsel %vm556_vm9, %v2298_v10, %v2302_v28  ;;  %v2406_v61 = vpop.permute.xlu2 %2405  ;;  %v387_v23 = vld [vmem:[%s4827_s1] sm:$0x7] }
 0x139   : > { %v2378_v12 = vunpack.i.h.bf16 %v2376_v15  ;;  %v2377_v13 = vunpack.i.l.bf16 %v2376_v15  ;;  %v2381_v16 = vpop.permute.xlu1 %2380  ;;  %628 = vmatpush.msra.mxu0 %v563_v51  ;;  %644 = vmatpush.msra.mxu1 %v576_v45  ;;  %v565_v30 = vsel %vm556_vm9, %v2302_v28, %v2303_v43  ;;  %v789_v60 = vsel %vm440_vm5, %v2397_v42, %v2398_v37 }
 0x13a   : > { %v2383_v54 = vunpack.i.h.bf16 %v2381_v16  ;;  %v2382_v17 = vunpack.i.l.bf16 %v2381_v16  ;;  %664 = vmatpush.msra.mxu2 %v577_v33  ;;  %v561_v40 = vsel %vm556_vm9, %v2288_v53, %v2292_v49  ;;  %v788_v31 = vsel %vm440_vm5, %v2232_v56, %v2397_v42 }
 0x13b   : > { %629 = vmatpush.msra.mxu0 %v560_v4  ;;  %645 = vmatpush.msra.mxu1 %v573_v18  ;;  %v748_v22 = vsel %vm418_vm1, %v2377_v13, %v2378_v12  ;;  %v562_v34 = vsel %vm556_vm9, %v2292_v49, %v2293_v47  ;;  %v2408_v44 = vunpack.i.h.bf16 %v2406_v61  ;;  %v558_v36 = vsel %vm556_vm9, %v2278_v50, %v2282_v57 }
 0x13c   : > { %665 = vmatpush.msra.mxu2 %v574_v19  ;;  %v750_v58 = vsel %vm418_vm1, %v2382_v17, %v2383_v54  ;;  %v749_v25 = vsel %vm418_vm1, %v2378_v12, %v2382_v17  ;;  %v2465_v53 = vpack.i.bf16 %v2398_v37, %v789_v60  ;;  %v2403_v9 = vunpack.i.h.bf16 %v3454_v35 }
 0x13d   : > { %630 = vmatpush.msra.mxu0 %v557_v3  ;;  %646 = vmatpush.msra.mxu1 %v570_v41  ;;  %v2445_v26 = vpack.i.bf16 %v2383_v54, %v750_v58  ;;  %v2440_v39 = vpack.i.bf16 %v749_v25, %v748_v22  ;;  %v559_v15 = vsel %vm556_vm9, %v2282_v57, %v2283_v14  ;;  %v2407_v45 = vunpack.i.l.bf16 %v2406_v61 }
 0x13e   : > { %666 = vmatpush.msra.mxu2 %v571_v6  ;;  %2159 = vmatmul.msk.f32.vlgmr.msra.gmra.mxu0 %vm611_vm10, %v388_v20  ;;  %v2460_v51 = vpack.i.bf16 %v788_v31, %v2232_v56  ;;  %v805_v50 = vsel %vm449_vm4, %v2402_v46, %v2403_v9  ;;  %v2252_v33 = vunpack.i.h.bf16 %v3292_v52  ;;  %v3549_v6 = vperm.slane %v387_v23, 0 }
 0x13f   : > { %2456 = vrot.lane.b32.xlu1 %v2455_v21, %s3156_s27  ;;  %2446 = vrot.lane.b32.xlu0 %v2445_v26, %s3156_s27  ;;  %v821_v29 = vsel %vm458_vm6, %v2407_v45, %v2408_v44  ;;  %v2475_v13 = vpack.i.bf16 %v2403_v9, %v805_v50  ;;  %v3567_v47 = vperm.slane %v387_v23, 1  ;;  %v3575_v57 = vperm.slane %v387_v23, 2 }
 0x140   : > { %2441 = vrot.lane.b32.xlu2 %v2440_v39, %s3156_s27  ;;  %647 = vmatpush.msra.mxu1 %v567_v63  ;;  %v2485_v12 = vpack.i.bf16 %v2408_v44, %v821_v29  ;;  %v820_v4 = vsel %vm458_vm6, %v2252_v33, %v2407_v45 }
 0x141   : > { %667 = vmatpush.msra.mxu2 %v568_v38  ;;  %v2386_v59 = vpop.permute.xlu1 %2385  ;;  %v2480_v11 = vpack.i.bf16 %v820_v4, %v2252_v33  ;;  %4878 = vst [vmem:[#allocation3_spill] sm:$0xff] %v3567_v47 }
 0x142   : > { %v2388_v5 = vunpack.i.h.bf16 %v2386_v59  ;;  %v2387_v48 = vunpack.i.l.bf16 %v2386_v59  ;;  %648 = vmatpush.msra.mxu1 %v564_v2  ;;  %4879 = vst [vmem:[#allocation4_spill] sm:$0xff] %v3575_v57 }
 0x143   : > { %668 = vmatpush.msra.mxu2 %v565_v30 }
 0x144   : > { %649 = vmatpush.msra.mxu1 %v561_v40  ;;  %v770_v10 = vsel %vm430_vm3, %v2387_v48, %v2388_v5  ;;  %v771_v62 = vsel %vm430_vm3, %v2388_v5, %v2392_v27  ;;  %v2242_v27 = vunpack.i.h.bf16 %v3297_v55  ;;  %v3523_v55 = vpop.permute.xlu2 %2410 }
 0x145   : > { %669 = vmatpush.msra.mxu2 %v562_v34  ;;  %v2450_v3 = vpack.i.bf16 %v771_v62, %v770_v10 }
 0x146   : > { %650 = vmatpush.msra.mxu1 %v558_v36  ;;  %v804_v7 = vsel %vm449_vm4, %v2242_v27, %v2402_v46 }
 0x147   : > { %670 = vmatpush.msra.mxu2 %v559_v15  ;;  %2160 = vmatmul.msk.f32.vlgmr.msra.gmra.mxu1 %vm611_vm10, %v388_v20  ;;  %v2470_v16 = vpack.i.bf16 %v804_v7, %v2242_v27 }
 0x148   : > { %2161 = vmatmul.msk.f32.vlgmr.msra.gmra.mxu2 %vm611_vm10, %v388_v20  ;;  %2461 = vrot.lane.b32.xlu1 %v2460_v51, %s3156_s27 }
 0x149   : > { %2451 = vrot.lane.b32.xlu0 %v2450_v3, %s3156_s27  ;;  %2466 = vrot.lane.b32.xlu2 %v2465_v53, %s3156_s27  ;;  %v3529_v17 = vpop.permute.xlu1 %2426 }
 0x14c   : > { %v3525_v35 = vpop.permute.xlu2 %2415 }
 0x150   : > { %2486 = vrot.lane.b32.xlu1 %v2485_v12, %s3156_s27 }
 0x151   : > { %2476 = vrot.lane.b32.xlu0 %v2475_v13, %s3156_s27  ;;  %2471 = vrot.lane.b32.xlu2 %v2470_v16, %s3156_s27 }
 0x154   : > { %v3527_v54 = vpop.permute.xlu2 %858 }
 0x159   : > { %2481 = vrot.lane.b32.xlu0 %v2480_v11, %s3156_s27 }
 0x190   : > { %v3531_v18 = vpop.permute.xlu2 %2436 }
 0x19a   : > { %v3535_v20 = vpop.permute.xlu2 %2441 }
 0x1a3   : > { %v3539_v21 = vpop.permute.xlu2 %2466 }
 0x1a4   : > { %v4839_v22 = vunpack.i.l.bf16 %v3539_v21 }
 0x1a8   : > { %v3533_v19 = vpop.permute.xlu1 %2431 }
 0x1ab   : > { %v3622_v10 = vpop.permute.xlu2 %2471 }
 0x1b1   : > { %v3537_v52 = vpop.permute.xlu1 %2456 }
 0x1b2   : > { %v4838_v31 = vunpack.i.l.bf16 %v3537_v52 }
 0x1ba   : > { %v3545_v41 = vpop.permute.xlu1 %2461 }
 0x1bb   : > { %v2464_v58 = vunpack.i.h.bf16 %v3545_v41  ;;  %v632_v25 = vpop.f32.mrf.mxu0 }
 0x1bc   : > { %v633_v28 = vadd.f32 %v632_v25, %v3359_v32 }
 0x1bd   : > { %v3556_v26 = vsel %vm556_vm9, %v2464_v58, %v4839_v22 }
 0x1be   : > { %v675_v39 = vmax.f32 %v633_v28, 0.0 }
 0x1c0   : > { %v685_v43 = vmul.f32 %v3549_v6, %v675_v39 }
 0x1c2   : > { %688 = vst [vmem:[#allocation2 + $0x30] sm:$0xff] %v685_v43  ;;  %v3560_v37 = vpack.i.bf16 %v685_v43, %v3147_v0  ;;  %v3630_v53 = vpop.permute.xlu1 %2486 }
 0x1c4   : > { %v652_v42 = vpop.f32.mrf.mxu1  ;;  %2501 = vrot.lane.b32.xlu0 %v3560_v37, %s3150_s21  ;;  %2496 = vrot.lane.b32.xlu2 %v3560_v37, %s3148_s19 }
 0x1c5   : > { %v653_v63 = vadd.f32 %v652_v42, %v3359_v32  ;;  %2491 = vrot.lane.b32.xlu1 %v3560_v37, %s3149_s20 }
 0x1c7   : > { %v676_v49 = vmax.f32 %v653_v63, 0.0 }
 0x1c9   : > { %v686_v38 = vmul.f32 %v3567_v47, %v676_v49 }
 0x1cb   : > { %689 = vst [vmem:[#allocation2 + $0x38] sm:$0xff] %v686_v38  ;;  %v672_v0 = vpop.f32.mrf.mxu2  ;;  %v3572_v56 = vpack.i.bf16 %v686_v38, %v685_v43 }
 0x1cc   : > { %v673_v14 = vadd.f32 %v672_v0, %v3359_v32  ;;  %2531 = vrot.lane.b32.xlu2 %v3560_v37, %s3156_s27  ;;  %v3593_v32 = vpop.permute.xlu0 %2421 }
 0x1cd   : > { %2506 = vrot.lane.b32.xlu0 %v3572_v56, %s3151_s22 }
 0x1ce   : > { %v677_v59 = vmax.f32 %v673_v14, 0.0 }
 0x1d0   : > { %v687_v2 = vmul.f32 %v3575_v57, %v677_v59 }
 0x1d2   : > { %690 = vst.msk [vmem:[#allocation2 + $0x40] sm:$0xff] %vm364_vm0, %v687_v2 }
 0x1d4   : > { %v3599_v60 = vpop.permute.xlu0 %2446 }
 0x1d5   : > { %2511 = vrot.lane.b32.xlu0 %v3572_v56, %s3152_s23 }
 0x1d9   : > { %v701_v5 = vld [vmem:[#allocation2 + $0x40] sm:$0xff] }
 0x1da   : > { %v3585_v48 = vpack.i.bf16 %v701_v5, %v686_v38  ;;  %v2550_v30 = vpack.i.bf16 %v3232_v1, %v701_v5 }
 0x1dc   : > { %2546 = vrot.lane.b32.xlu1 %v3585_v48, %s3150_s21  ;;  %2536 = vrot.lane.b32.xlu2 %v3585_v48, %s3149_s20  ;;  %v3605_v40 = vpop.permute.xlu0 %2451 }
 0x1dd   : > { %2516 = vrot.lane.b32.xlu0 %v3572_v56, %s3153_s24  ;;  %v2454_v61 = vunpack.i.h.bf16 %v3605_v40 }
 0x1df   : > { %v3616_v34 = vsel %vm556_vm9, %v2454_v61, %v4838_v31  ;;  %v4843_v31 = vunpack.i.l.bf16 %v3630_v53 }
 0x1e4   : > { %2551 = vrot.lane.b32.xlu1 %v2550_v30, %s3151_s22  ;;  %v3624_v62 = vpop.permute.xlu0 %2476 }
 0x1e5   : > { %2521 = vrot.lane.b32.xlu0 %v3572_v56, %s3154_s25 }
 0x1ec   : > { %2556 = vrot.lane.b32.xlu1 %v2550_v30, %s3152_s23  ;;  %v3626_v36 = vpop.permute.xlu0 %2481 }
 0x1ed   : > { %2526 = vrot.lane.b32.xlu0 %v3572_v56, %s3155_s26  ;;  %v2483_v22 = vunpack.i.l.bf16 %v3626_v36 }
 0x1f4   : > { %2561 = vrot.lane.b32.xlu1 %v2550_v30, %s3153_s24 }
 0x1f5   : > { %2541 = vrot.lane.b32.xlu0 %v3585_v48, %s3148_s19 }
 0x1fc   : > { %834 = vrot.lane.b32.xlu1 %v701_v5, %s3154_s25 }
 0x1fd   : > { %2566 = vrot.lane.b32.xlu0 %v3585_v48, %s3156_s27 }
 0x204   : > { %850 = vrot.lane.b32.xlu1 %v701_v5, %s3155_s26 }
 0x21e   : > { %v2497_v44 = vpop.permute.xlu2 %2496 }
 0x226   : > { %v3628_v3 = vpop.permute.xlu2 %2531 }
 0x236   : > { %v3632_v9 = vpop.permute.xlu2 %2536  ;;  %v2502_v15 = vpop.permute.xlu0 %2501 }
 0x237   : > { %v2492_v51 = vpop.permute.xlu1 %2491  ;;  %v2538_v45 = vunpack.i.l.bf16 %v3632_v9  ;;  %v2504_v23 = vunpack.i.h.bf16 %v2502_v15  ;;  %v2503_v25 = vunpack.i.l.bf16 %v2502_v15 }
 0x238   : > { %v2494_v46 = vunpack.i.h.bf16 %v2492_v51  ;;  %v2493_v29 = vunpack.i.l.bf16 %v2492_v51 }
 0x239   : > { %v773_v49 = vsel %vm430_vm3, %v2503_v25, %v2504_v23 }
 0x23a   : > { %v729_v27 = vsel %vm406_vm2, %v2493_v29, %v2494_v46  ;;  %v730_v50 = vsel %vm406_vm2, %v2494_v46, %v2538_v45 }
 0x23b   : > { %v2570_v7 = vpack.i.bf16 %v730_v50, %v729_v27  ;;  %v2499_v27 = vunpack.i.h.bf16 %v2497_v44  ;;  %v2498_v50 = vunpack.i.l.bf16 %v2497_v44 }
 0x23d   : > { %2571 = vrot.lane.b32.xlu0 %v2570_v7, %s3156_s27 }
 0x23f   : > { %v3640_v12 = vpop.permute.xlu0 %2506 }
 0x240   : > { %v2509_v13 = vunpack.i.h.bf16 %v3640_v12  ;;  %v2508_v16 = vunpack.i.l.bf16 %v3640_v12 }
 0x242   : > { %v790_v33 = vsel %vm440_vm5, %v2508_v16, %v2509_v13 }
 0x243   : > { %v2585_v4 = vpack.i.bf16 %v790_v33, %v2508_v16 }
 0x245   : > { %2586 = vrot.lane.b32.xlu0 %v2585_v4, %s3156_s27 }
 0x247   : > { %v2512_v11 = vpop.permute.xlu0 %2511 }
 0x248   : > { %v2513_v44 = vunpack.i.l.bf16 %v2512_v11 }
 0x24e   : > { %v2547_v28 = vpop.permute.xlu1 %2546 }
 0x24f   : > { %v2549_v39 = vunpack.i.h.bf16 %v2547_v28  ;;  %v2548_v43 = vunpack.i.l.bf16 %v2547_v28  ;;  %v2517_v42 = vpop.permute.xlu0 %2516 }
 0x250   : > { %v2519_v59 = vunpack.i.h.bf16 %v2517_v42  ;;  %v2518_v2 = vunpack.i.l.bf16 %v2517_v42 }
 0x251   : > { %v775_v63 = vsel %vm430_vm3, %v2548_v43, %v2549_v39  ;;  %v774_v38 = vsel %vm430_vm3, %v2504_v23, %v2548_v43  ;;  %v751_v43 = vsel %vm418_vm1, %v2498_v50, %v2499_v27 }
 0x252   : > { %v2615_v0 = vpack.i.bf16 %v2549_v39, %v775_v63  ;;  %v2580_v14 = vpack.i.bf16 %v774_v38, %v773_v49  ;;  %v822_v30 = vsel %vm458_vm6, %v2518_v2, %v2519_v59  ;;  %v2514_v38 = vunpack.i.h.bf16 %v2512_v11 }
 0x253   : > { %v2595_v51 = vpack.i.bf16 %v822_v30, %v2518_v2  ;;  %v2412_v30 = vunpack.i.l.bf16 %v3523_v55  ;;  %v2534_v11 = vunpack.i.h.bf16 %v3628_v3 }
 0x254   : > { %2581 = vrot.lane.b32.xlu2 %v2580_v14, %s3156_s27  ;;  %2616 = vrot.lane.b32.xlu0 %v2615_v0, %s3156_s27  ;;  %v2413_v14 = vunpack.i.h.bf16 %v3523_v55  ;;  %v806_v50 = vsel %vm449_vm4, %v2513_v44, %v2514_v38 }
 0x256   : > { %v3653_v5 = vpop.permute.xlu1 %2551 }
 0x257   : > { %v2522_v15 = vpop.permute.xlu0 %2521 }
 0x258   : > { %v2524_v2 = vunpack.i.h.bf16 %v2522_v15 }
 0x25c   : > { %2596 = vrot.lane.b32.xlu2 %v2595_v51, %s3156_s27 }
 0x25e   : > { %v3657_v46 = vpop.permute.xlu1 %2556 }
 0x25f   : > { %v3659_v29 = vpop.permute.xlu0 %2526  ;;  %v2558_v0 = vunpack.i.l.bf16 %v3657_v46 }
 0x266   : > { %v3661_v7 = vpop.permute.xlu1 %2561 }
 0x267   : > { %v2563_v16 = vunpack.i.l.bf16 %v3661_v7  ;;  %v2542_v33 = vpop.permute.xlu0 %2541 }
 0x268   : > { %v2544_v4 = vunpack.i.h.bf16 %v2542_v33  ;;  %v2543_v23 = vunpack.i.l.bf16 %v2542_v33 }
 0x269   : > { %v823_v25 = vsel %vm458_vm6, %v2519_v59, %v2563_v16 }
 0x26a   : > { %v2635_v28 = vpack.i.bf16 %v2563_v16, %v823_v25  ;;  %v753_v39 = vsel %vm418_vm1, %v2543_v23, %v2544_v4  ;;  %v752_v42 = vsel %vm418_vm1, %v2499_v27, %v2543_v23  ;;  %v807_v16 = vsel %vm449_vm4, %v2514_v38, %v2558_v0 }
 0x26b   : > { %v2610_v63 = vpack.i.bf16 %v2544_v4, %v753_v39  ;;  %v2575_v49 = vpack.i.bf16 %v752_v42, %v751_v43  ;;  %v837_v4 = vsel %vm467_vm8, %v2412_v30, %v2413_v14  ;;  %v2590_v25 = vpack.i.bf16 %v806_v50, %v2513_v44 }
 0x26c   : > { %2636 = vrot.lane.b32.xlu0 %v2635_v28, %s3156_s27  ;;  %v2625_v28 = vpack.i.bf16 %v2558_v0, %v807_v16  ;;  %v2523_v39 = vunpack.i.l.bf16 %v2522_v15  ;;  %v2529_v43 = vunpack.i.h.bf16 %v3659_v29  ;;  %v2528_v42 = vunpack.i.l.bf16 %v3659_v29 }
 0x26d   : > { %2576 = vrot.lane.b32.xlu1 %v2575_v49, %s3156_s27  ;;  %2611 = vrot.lane.b32.xlu2 %v2610_v63, %s3156_s27  ;;  %v2262_v63 = vunpack.i.h.bf16 %v3307_v8  ;;  %v2417_v29 = vunpack.i.l.bf16 %v3525_v35  ;;  %v2272_v8 = vunpack.i.h.bf16 %v3317_v24 }
 0x26e   : > { %v835_v59 = vpop.permute.xlu1 %834  ;;  %v854_v15 = vsel %vm476_vm7, %v2528_v42, %v2529_v43 }
 0x26f   : > { %v839_v51 = vsel %vm467_vm8, %v2524_v2, %v835_v59  ;;  %v3675_v27 = vpop.permute.xlu0 %2566  ;;  %v836_v44 = vsel %vm467_vm8, %v2262_v63, %v2412_v30  ;;  %v3708_v30 = vld [vmem:[#allocation2] sm:$0xff] }
 0x270   : > { %v4837_v33 = vunpack.i.l.bf16 %v3675_v27  ;;  %v2640_v23 = vpack.i.bf16 %v837_v4, %v839_v51  ;;  %v838_v51 = vsel %vm467_vm8, %v2523_v39, %v2524_v2  ;;  %v2630_v16 = vpack.i.bf16 %v836_v44, %v2262_v63 }
 0x271   : > { %v2600_v50 = vpack.i.bf16 %v838_v51, %v2523_v39  ;;  %v2539_v4 = vunpack.i.h.bf16 %v3632_v9  ;;  %v2645_v63 = vpack.i.bf16 %v835_v59, %v2413_v14  ;;  %v3741_v14 = vld [vmem:[#allocation2 + $0x18] sm:$0xff] }
 0x272   : > { %v3687_v55 = vsel %vm556_vm9, %v2534_v11, %v4837_v33 }
 0x273   : > { %v731_v2 = vsel %vm406_vm2, %v2538_v45, %v2539_v4 }
 0x274   : > { %2641 = vrot.lane.b32.xlu0 %v2640_v23, %s3156_s27  ;;  %v3712_v23 = vpack.i.bf16 %v3232_v1, %v3708_v30  ;;  %v2418_v1 = vunpack.i.h.bf16 %v3525_v35 }
 0x275   : > { %2591 = vrot.lane.b32.xlu1 %v2590_v25, %s3156_s27  ;;  %2626 = vrot.lane.b32.xlu2 %v2625_v28, %s3156_s27  ;;  %v852_v25 = vsel %vm476_vm7, %v2272_v8, %v2417_v29  ;;  %v2605_v28 = vpack.i.bf16 %v2539_v4, %v731_v2 }
 0x276   : > { %v851_v49 = vpop.permute.xlu1 %850  ;;  %v2650_v39 = vpack.i.bf16 %v852_v25, %v2272_v8  ;;  %v853_v35 = vsel %vm476_vm7, %v2417_v29, %v2418_v1 }
 0x277   : > { %v855_v38 = vsel %vm476_vm7, %v2529_v43, %v851_v49  ;;  %v2553_v43 = vunpack.i.l.bf16 %v3653_v5  ;;  %v2665_v45 = vpack.i.bf16 %v851_v49, %v2418_v1  ;;  %v2660_v12 = vpack.i.bf16 %v2528_v42, %v853_v35 }
 0x278   : > { %v2655_v0 = vpack.i.bf16 %v855_v38, %v854_v15 }
 0x279   : > { %v791_v24 = vsel %vm440_vm5, %v2509_v13, %v2553_v43  ;;  %v3739_v13 = vld [vmem:[#allocation2 + $0x10] sm:$0xff] }
 0x27a   : > { %v2620_v9 = vpack.i.bf16 %v2553_v43, %v791_v24  ;;  %v2675_v59 = vpack.i.bf16 %v3741_v14, %v3739_v13 }
 0x27c   : > { %2656 = vrot.lane.b32.xlu0 %v2655_v0, %s3156_s27 }
 0x27d   : > { %2601 = vrot.lane.b32.xlu1 %v2600_v50, %s3156_s27  ;;  %2631 = vrot.lane.b32.xlu2 %v2630_v16, %s3156_s27 }
 0x284   : > { %2671 = vrot.lane.b32.xlu0 %v3712_v23, %s3149_s20 }
 0x285   : > { %2606 = vrot.lane.b32.xlu1 %v2605_v28, %s3156_s27  ;;  %2651 = vrot.lane.b32.xlu2 %v2650_v39, %s3156_s27 }
 0x28c   : > { %2686 = vrot.lane.b32.xlu0 %v3585_v48, %s3149_s20 }
 0x28d   : > { %2621 = vrot.lane.b32.xlu1 %v2620_v9, %s3156_s27  ;;  %2666 = vrot.lane.b32.xlu2 %v2665_v45, %s3156_s27 }
 0x294   : > { %2691 = vrot.lane.b32.xlu0 %v3712_v23, %s3148_s19 }
 0x295   : > { %2646 = vrot.lane.b32.xlu1 %v2645_v63, %s3156_s27  ;;  %2681 = vrot.lane.b32.xlu2 %v3560_v37, %s3149_s20 }
 0x29c   : > { %2706 = vrot.lane.b32.xlu0 %v3585_v48, %s3148_s19 }
 0x29d   : > { %2661 = vrot.lane.b32.xlu1 %v2660_v12, %s3156_s27  ;;  %2701 = vrot.lane.b32.xlu2 %v3560_v37, %s3148_s19 }
 0x2a4   : > { %2711 = vrot.lane.b32.xlu0 %v3712_v23, %s3150_s21 }
 0x2a5   : > { %2676 = vrot.lane.b32.xlu1 %v2675_v59, %s3149_s20  ;;  %2721 = vrot.lane.b32.xlu2 %v3560_v37, %s3150_s21 }
 0x2ac   : > { %2726 = vrot.lane.b32.xlu0 %v3585_v48, %s3150_s21 }
 0x2ad   : > { %2696 = vrot.lane.b32.xlu1 %v2675_v59, %s3148_s19  ;;  %2746 = vrot.lane.b32.xlu2 %v3572_v56, %s3152_s23 }
 0x2ae   : > { %v3758_v42 = vpop.permute.xlu2 %2581 }
 0x2af   : > { %v3764_v48 = vpop.permute.xlu0 %2571 }
 0x2b4   : > { %2731 = vrot.lane.b32.xlu0 %v2675_v59, %s3151_s22 }
 0x2b5   : > { %2716 = vrot.lane.b32.xlu1 %v2675_v59, %s3150_s21  ;;  %2751 = vrot.lane.b32.xlu2 %v2675_v59, %s3153_s24 }
 0x2b6   : > { %v2597_v37 = vpop.permute.xlu2 %2596 }
 0x2b7   : > { %v3773_v38 = vpop.permute.xlu0 %2586  ;;  %v2599_v63 = vunpack.i.h.bf16 %v2597_v37  ;;  %v2598_v12 = vunpack.i.l.bf16 %v2597_v37 }
 0x2bc   : > { %2756 = vrot.lane.b32.xlu0 %v3572_v56, %s3153_s24 }
 0x2bd   : > { %2736 = vrot.lane.b32.xlu1 %v3572_v56, %s3151_s22 }
 0x2c4   : > { %2761 = vrot.lane.b32.xlu0 %v3572_v56, %s3155_s26 }
 0x2c5   : > { %2741 = vrot.lane.b32.xlu1 %v2675_v59, %s3152_s23 }
 0x2c6   : > { %v3779_v44 = vpop.permute.xlu0 %2616 }
 0x2c7   : > { %v3769_v49 = vpop.permute.xlu2 %2611 }
 0x2cc   : > { %2771 = vrot.lane.b32.xlu0 %v3572_v56, %s3154_s25 }
 0x2cf   : > { %v3775_v51 = vpop.permute.xlu2 %2626 }
 0x2d4   : > { %1448 = vrot.lane.b32.xlu0 %v3741_v14, %s3154_s25 }
 0x2d7   : > { %v2632_v15 = vpop.permute.xlu2 %2631 }
 0x2d8   : > { %v2634_v8 = vunpack.i.h.bf16 %v2632_v15  ;;  %v2633_v2 = vunpack.i.l.bf16 %v2632_v15 }
 0x2de   : > { %v3781_v0 = vpop.permute.xlu0 %2636 }
 0x2df   : > { %v3783_v50 = vpop.permute.xlu1 %2576  ;;  %v3787_v29 = vpop.permute.xlu2 %2651  ;;  %v4842_v59 = vunpack.i.l.bf16 %v3781_v0 }
 0x2e6   : > { %v3785_v16 = vpop.permute.xlu0 %2641 }
 0x2e7   : > { %v2592_v4 = vpop.permute.xlu1 %2591  ;;  %v2644_v43 = vunpack.i.h.bf16 %v3785_v16  ;;  %v2643_v24 = vunpack.i.l.bf16 %v3785_v16  ;;  %v3795_v1 = vpop.permute.xlu2 %2666  ;;  %v2479_v16 = vunpack.i.h.bf16 %v3624_v62 }
 0x2e9   : > { %v1048_v37 = vsel %vm556_vm9, %v2634_v8, %v2644_v43 }
 0x2ee   : > { %v3789_v56 = vpop.permute.xlu0 %2656 }
 0x2ef   : > { %v4840_v25 = vunpack.i.h.bf16 %v3789_v56  ;;  %v4841_v28 = vunpack.i.l.bf16 %v3789_v56  ;;  %v2602_v39 = vpop.permute.xlu1 %2601 }
 0x2f0   : > { %v2604_v9 = vunpack.i.h.bf16 %v2602_v39  ;;  %v2603_v45 = vunpack.i.l.bf16 %v2602_v39  ;;  %v2484_v39 = vunpack.i.h.bf16 %v3626_v36  ;;  %v2474_v36 = vunpack.i.h.bf16 %v3622_v10 }
 0x2f1   : > { %v1057_v35 = vsel %vm556_vm9, %v4841_v28, %v4840_v25  ;;  %v1047_v25 = vsel %vm556_vm9, %v2633_v2, %v2634_v8  ;;  %v2473_v2 = vunpack.i.l.bf16 %v3622_v10  ;;  %v4844_v8 = vunpack.i.l.bf16 %v3624_v62 }
 0x2f2   : > { %1191 = vmatpush.msrb.mxu2 %v1057_v35  ;;  %v1050_v15 = vsel %vm556_vm9, %v2603_v45, %v2604_v9  ;;  %v1051_v33 = vsel %vm556_vm9, %v2604_v9, %v2643_v24  ;;  %v2594_v45 = vunpack.i.h.bf16 %v2592_v4  ;;  %v2593_v35 = vunpack.i.l.bf16 %v2592_v4 }
 0x2f3   : > { %1117 = vmatpush.msra.mxu3 %v1050_v15  ;;  %1157 = vmatpush.msrb.mxu1 %v1051_v33  ;;  %v1044_v9 = vsel %vm556_vm9, %v2598_v12, %v2599_v63  ;;  %v1045_v33 = vsel %vm556_vm9, %v2599_v63, %v4842_v59  ;;  %v2628_v4 = vunpack.i.l.bf16 %v3775_v51  ;;  %v1042_v12 = vsel %vm556_vm9, %v2484_v39, %v4843_v31 }
 0x2f4   : > { %v2589_v63 = vunpack.i.h.bf16 %v3773_v38  ;;  %v2588_v10 = vunpack.i.l.bf16 %v3773_v38  ;;  %v1035_v59 = vsel %vm556_vm9, %v2473_v2, %v2474_v36  ;;  %v2583_v38 = vunpack.i.l.bf16 %v3758_v42 }
 0x2f5   : > { %1118 = vmatpush.msra.mxu3 %v1047_v25  ;;  %1158 = vmatpush.msrb.mxu1 %v1048_v37  ;;  %v1041_v25 = vsel %vm556_vm9, %v2483_v22, %v2484_v39  ;;  %v2682_v37 = vpop.permute.xlu2 %2681  ;;  %v2463_v22 = vunpack.i.l.bf16 %v3545_v41  ;;  %v1036_v39 = vsel %vm556_vm9, %v2474_v36, %v4844_v8  ;;  %v2453_v2 = vunpack.i.l.bf16 %v3605_v40 }
 0x2f6   : > { %v3814_v28 = vpop.permute.xlu0 %2671  ;;  %v2578_v8 = vunpack.i.l.bf16 %v3783_v50 }
 0x2f7   : > { %v3822_v15 = vpop.permute.xlu1 %2606  ;;  %1119 = vmatpush.msra.mxu3 %v1044_v9  ;;  %1159 = vmatpush.msrb.mxu1 %v1045_v33  ;;  %v1038_v9 = vsel %vm556_vm9, %v2593_v35, %v2594_v45  ;;  %v1039_v33 = vsel %vm556_vm9, %v2594_v45, %v2628_v4  ;;  %v2683_v35 = vunpack.i.l.bf16 %v2682_v37  ;;  %v1032_v45 = vsel %vm556_vm9, %v2588_v10, %v2589_v63 }
 0x2f9   : > { %1120 = vmatpush.msra.mxu3 %v1041_v25  ;;  %1160 = vmatpush.msrb.mxu1 %v1042_v12  ;;  %v2584_v25 = vunpack.i.h.bf16 %v3758_v42  ;;  %v2684_v12 = vunpack.i.h.bf16 %v2682_v37  ;;  %v1029_v42 = vsel %vm556_vm9, %v2463_v22, %v2464_v58  ;;  %v2444_v22 = vunpack.i.h.bf16 %v3535_v20 }
 0x2fb   : > { %1121 = vmatpush.msra.mxu3 %v1038_v9  ;;  %1161 = vmatpush.msrb.mxu1 %v1039_v33  ;;  %v3856_v37 = vsel %vm406_vm2, %v2683_v35, %v2684_v12  ;;  %v2573_v35 = vunpack.i.l.bf16 %v3764_v48 }
 0x2fd   : > { %1122 = vmatpush.msra.mxu3 %v1035_v59  ;;  %1162 = vmatpush.msrb.mxu1 %v1036_v39  ;;  %v2618_v59 = vunpack.i.l.bf16 %v3779_v44  ;;  %v1026_v39 = vsel %vm556_vm9, %v2583_v38, %v2584_v25  ;;  %v1023_v38 = vsel %vm556_vm9, %v2453_v2, %v2454_v61  ;;  %v2448_v61 = vunpack.i.l.bf16 %v3599_v60 }
 0x2fe   : > { %v3843_v31 = vpop.permute.xlu0 %2686 }
 0x2ff   : > { %v2688_v9 = vunpack.i.l.bf16 %v3843_v31  ;;  %v3847_v33 = vpop.permute.xlu1 %2621  ;;  %1123 = vmatpush.msra.mxu3 %v1032_v45  ;;  %v2579_v45 = vunpack.i.h.bf16 %v3783_v50  ;;  %v2574_v50 = vunpack.i.h.bf16 %v3764_v48  ;;  %v2613_v48 = vunpack.i.l.bf16 %v3769_v49 }
 0x300   : > { %v2623_v36 = vunpack.i.l.bf16 %v3847_v33 }
 0x301   : > { %v3861_v10 = vsel %vm406_vm2, %v2684_v12, %v2688_v9  ;;  %1124 = vmatpush.msra.mxu3 %v1029_v42  ;;  %v2443_v12 = vunpack.i.l.bf16 %v3535_v20  ;;  %v2434_v20 = vunpack.i.h.bf16 %v3533_v19 }
 0x302   : > { %v1033_v58 = vsel %vm556_vm9, %v2589_v63, %v2623_v36  ;;  %v1020_v63 = vsel %vm556_vm9, %v2578_v8, %v2579_v45  ;;  %v2533_v8 = vunpack.i.l.bf16 %v3628_v3  ;;  %v3924_v3 = vld [vmem:[%s4830_s4] sm:$0xff] }
 0x303   : > { %1125 = vmatpush.msra.mxu3 %v1026_v39  ;;  %1163 = vmatpush.msrb.mxu1 %v1033_v58  ;;  %v1027_v39 = vsel %vm556_vm9, %v2584_v25, %v2618_v59  ;;  %v1017_v2 = vsel %vm556_vm9, %v2443_v12, %v2444_v22  ;;  %v2608_v25 = vunpack.i.l.bf16 %v3822_v15  ;;  %v1014_v58 = vsel %vm556_vm9, %v2573_v35, %v2574_v50  ;;  %v3132_v35 = vld [vmem:[#allocation2 + $0x8] sm:$0xff] }
 0x304   : > { %v1018_v12 = vsel %vm556_vm9, %v2444_v22, %v2448_v61  ;;  %v1008_v41 = vsel %vm556_vm9, %v2533_v8, %v2534_v11  ;;  %v2654_v11 = vunpack.i.h.bf16 %v3787_v29 }
 0x305   : > { %1126 = vmatpush.msra.mxu3 %v1023_v38  ;;  %1164 = vmatpush.msrb.mxu1 %v3556_v26  ;;  %v2433_v26 = vunpack.i.l.bf16 %v3533_v19  ;;  %v1021_v38 = vsel %vm556_vm9, %v2579_v45, %v2613_v48  ;;  %v2438_v19 = vunpack.i.l.bf16 %v3531_v18 }
 0x306   : > { %v3879_v42 = vpop.permute.xlu0 %2691 }
 0x307   : > { %v3886_v40 = vpop.permute.xlu1 %2646  ;;  %1127 = vmatpush.msra.mxu3 %v1020_v63  ;;  %1165 = vmatpush.msrb.mxu1 %v1027_v39  ;;  %v2424_v63 = vunpack.i.h.bf16 %v3593_v32  ;;  %v2423_v39 = vunpack.i.l.bf16 %v3593_v32  ;;  %v1015_v32 = vsel %vm556_vm9, %v2574_v50, %v2608_v25  ;;  %v2653_v50 = vunpack.i.l.bf16 %v3787_v29 }
 0x308   : > { %v4880_v29 = vunpack.i.l.bf16 %v3789_v56 }
 0x309   : > { %1128 = vmatpush.msra.mxu3 %v1017_v2  ;;  %1166 = vmatpush.msrb.mxu1 %v3616_v34  ;;  %v1011_v34 = vsel %vm556_vm9, %v2433_v26, %v2434_v20  ;;  %v2775_v2 = vpack.i.bf16 %v3739_v13, %v3132_v35  ;;  %v1012_v13 = vsel %vm556_vm9, %v2434_v20, %v2438_v19 }
 0x30b   : > { %1129 = vmatpush.msra.mxu3 %v1014_v58  ;;  %1167 = vmatpush.msrb.mxu1 %v1021_v38  ;;  %v1005_v38 = vsel %vm556_vm9, %v2423_v39, %v2424_v63 }
 0x30c   : > { %2776 = vrot.lane.b32.xlu2 %v2775_v2, %s3154_s25  ;;  %2766 = vrot.lane.b32.xlu1 %v2775_v2, %s3155_s26  ;;  %v692_v2 = vld [vmem:[%s4830_s4 + $0x8] sm:$0xff] }
 0x30d   : > { %1130 = vmatpush.msra.mxu3 %v1011_v34  ;;  %1168 = vmatpush.msrb.mxu1 %v1018_v12  ;;  %v2649_v12 = vunpack.i.h.bf16 %v3886_v40 }
 0x30e   : > { %v3907_v45 = vpop.permute.xlu0 %2706 }
 0x30f   : > { %v2709_v26 = vunpack.i.h.bf16 %v3907_v45  ;;  %v2708_v58 = vunpack.i.l.bf16 %v3907_v45  ;;  %v2662_v22 = vpop.permute.xlu1 %2661  ;;  %1131 = vmatpush.msra.mxu3 %v1008_v41  ;;  %1169 = vmatpush.msrb.mxu1 %v1015_v32  ;;  %v2428_v41 = vunpack.i.l.bf16 %v3529_v17  ;;  %v2669_v32 = vunpack.i.h.bf16 %v3795_v1 }
 0x310   : > { %v2664_v8 = vunpack.i.h.bf16 %v2662_v22  ;;  %v2663_v34 = vunpack.i.l.bf16 %v2662_v22  ;;  %v2648_v22 = vunpack.i.l.bf16 %v3886_v40 }
 0x311   : > { %v1335_v20 = vsel %vm418_vm1, %v2708_v58, %v2709_v26  ;;  %1132 = vmatpush.msra.mxu3 %v1005_v38  ;;  %1170 = vmatpush.msrb.mxu1 %v1012_v13  ;;  %v1053_v38 = vsel %vm556_vm9, %v2653_v50, %v2654_v11  ;;  %v2668_v13 = vunpack.i.l.bf16 %v3795_v1  ;;  %v1052_v1 = vsel %vm556_vm9, %v2643_v24, %v2649_v12 }
 0x312   : > { %v3934_v39 = vpack.i.bf16 %v2709_v26, %v1335_v20  ;;  %1133 = vmatmul.f32.vlgmr.msra.gmra.mxu3 %v3924_v3  ;;  %v1056_v35 = vsel %vm556_vm9, %v2664_v8, %v4880_v29  ;;  %v1054_v26 = vsel %vm556_vm9, %v2654_v11, %v2663_v34  ;;  %v4881_v8 = vunpack.i.h.bf16 %v3789_v56 }
 0x313   : > { %1151 = vmatpush.msrb.mxu0 %v1056_v35  ;;  %1171 = vmatpush.msrb.mxu1 %v3687_v55  ;;  %v1006_v55 = vsel %vm556_vm9, %v2424_v63, %v2428_v41  ;;  %v2639_v29 = vunpack.i.h.bf16 %v3781_v0  ;;  %v1055_v56 = vsel %vm556_vm9, %v2663_v34, %v2668_v13  ;;  %v2489_v11 = vunpack.i.h.bf16 %v3630_v53 }
 0x314   : > { %1192 = vmatpush.msrb.mxu2 %v1054_v26  ;;  %v1058_v20 = vsel %vm556_vm9, %v4881_v8, %v2669_v32  ;;  %v1049_v32 = vsel %vm556_vm9, %v2644_v43, %v2648_v22  ;;  %1472 = vrot.lane.b32.xlu1 %v3741_v14, %s3155_s26  ;;  %v2629_v24 = vunpack.i.h.bf16 %v3775_v51  ;;  %v4882_v12 = vunpack.i.l.bf16 %v3781_v0 }
 0x315   : > { %2163 = vmatmul.msk.f32.vlgmr.msrb.gmra.mxu2 %vm1113_vm11, %v692_v2  ;;  %1152 = vmatpush.msrb.mxu0 %v1053_v38  ;;  %v4883_v43 = vunpack.i.l.bf16 %v3630_v53  ;;  %v2624_v14 = vunpack.i.h.bf16 %v3847_v33  ;;  %v2469_v53 = vunpack.i.h.bf16 %v3539_v21 }
 0x316   : > { %v3958_v35 = vpop.permute.xlu0 %2711  ;;  %1231 = vmatpush.msra.mxu2 %v1058_v20  ;;  %1172 = vmatpush.msrb.mxu1 %v1006_v55  ;;  %v1046_v26 = vsel %vm556_vm9, %v4882_v12, %v2639_v29  ;;  %v1040_v0 = vsel %vm556_vm9, %v2628_v4, %v2629_v24  ;;  %v2619_v4 = vunpack.i.h.bf16 %v3779_v44  ;;  %v2459_v24 = vunpack.i.h.bf16 %v3537_v52  ;;  %v2702_v44 = vpop.permute.xlu2 %2701 }
 0x317   : > { %1173 = vmatmul.f32.vlgmr.msrb.gmra.mxu1 %v3924_v3  ;;  %1197 = vmatpush.msra.mxu0 %v1052_v1  ;;  %v3965_v40 = vpop.permute.xlu1 %2676  ;;  %v1043_v22 = vsel %vm556_vm9, %v4883_v43, %v2489_v11  ;;  %v4884_v1 = vunpack.i.l.bf16 %v3624_v62 }
 0x318   : > { %1232 = vmatpush.msra.mxu2 %v1055_v56  ;;  %v2679_v63 = vunpack.i.h.bf16 %v3965_v40  ;;  %v2678_v50 = vunpack.i.l.bf16 %v3965_v40  ;;  %2162 = vmatmul.msk.f32.vlgmr.msrb.gmra.mxu0 %vm1113_vm11, %v692_v2  ;;  %v1028_v33 = vsel %vm556_vm9, %v2618_v59, %v2619_v4 }
 0x319   : > { %1198 = vmatpush.msra.mxu0 %v1049_v32  ;;  %v1037_v56 = vsel %vm556_vm9, %v4884_v1, %v2479_v16  ;;  %v1034_v32 = vsel %vm556_vm9, %v2623_v36, %v2624_v14 }
 0x31a   : > { %v1299_v34 = vsel %vm406_vm2, %v2678_v50, %v2679_v63 }
 0x31b   : > { %v3983_v38 = vpack.i.bf16 %v2679_v63, %v1299_v34  ;;  %1199 = vmatpush.msra.mxu0 %v1046_v26  ;;  %v4885_v34 = vunpack.i.l.bf16 %v3539_v21  ;;  %v2614_v26 = vunpack.i.h.bf16 %v3769_v49  ;;  %v2449_v21 = vunpack.i.h.bf16 %v3599_v60 }
 0x31d   : > { %1200 = vmatpush.msra.mxu0 %v1043_v22  ;;  %2164 = vmatmul.msk.f32.vlgmr.msra.gmra.mxu2 %vm1113_vm11, %v692_v2  ;;  %v1031_v12 = vsel %vm556_vm9, %v4885_v34, %v2469_v53  ;;  %v2429_v34 = vunpack.i.h.bf16 %v3529_v17 }
 0x31e   : > { %v3991_v13 = vpop.permute.xlu0 %2726 }
 0x31f   : > { %v2729_v8 = vunpack.i.h.bf16 %v3991_v13  ;;  %v2728_v20 = vunpack.i.l.bf16 %v3991_v13  ;;  %1201 = vmatpush.msra.mxu0 %v1040_v0  ;;  %v3998_v55 = vpop.permute.xlu1 %2696  ;;  %v2704_v13 = vunpack.i.h.bf16 %v2702_v44 }
 0x320   : > { %v2699_v29 = vunpack.i.h.bf16 %v3998_v55  ;;  %v2698_v2 = vunpack.i.l.bf16 %v3998_v55 }
 0x321   : > { %v1368_v51 = vsel %vm430_vm3, %v2728_v20, %v2729_v8  ;;  %1202 = vmatpush.msra.mxu0 %v1037_v56 }
 0x322   : > { %v4010_v11 = vpack.i.bf16 %v2729_v8, %v1368_v51  ;;  %v1332_v63 = vsel %vm418_vm1, %v2698_v2, %v2699_v29  ;;  %v4886_v8 = vunpack.i.l.bf16 %v3537_v52  ;;  %v1022_v51 = vsel %vm556_vm9, %v2613_v48, %v2614_v26 }
 0x323   : > { %v4018_v62 = vpack.i.bf16 %v2699_v29, %v1332_v63  ;;  %1203 = vmatpush.msra.mxu0 %v1034_v32  ;;  %v2609_v29 = vunpack.i.h.bf16 %v3822_v15  ;;  %v2439_v52 = vunpack.i.h.bf16 %v3531_v18  ;;  %v1019_v63 = vsel %vm556_vm9, %v2448_v61, %v2449_v21 }
 0x324   : > { %v1025_v53 = vsel %vm556_vm9, %v4886_v8, %v2459_v24  ;;  %v2569_v32 = vunpack.i.h.bf16 %v3675_v27 }
 0x325   : > { %1204 = vmatpush.msra.mxu0 %v1031_v12  ;;  %v1016_v49 = vsel %vm556_vm9, %v2608_v25, %v2609_v29  ;;  %v1013_v61 = vsel %vm556_vm9, %v2438_v19, %v2439_v52  ;;  %v4887_v25 = vunpack.i.l.bf16 %v3675_v27 }
 0x326   : > { %v4025_v16 = vpop.permute.xlu0 %2731 }
 0x327   : > { %v2734_v36 = vunpack.i.h.bf16 %v4025_v16  ;;  %v2733_v43 = vunpack.i.l.bf16 %v4025_v16  ;;  %1205 = vmatpush.msra.mxu0 %v1028_v33  ;;  %v4032_v22 = vpop.permute.xlu1 %2716  ;;  %v1010_v26 = vsel %vm556_vm9, %v4887_v25, %v2569_v32  ;;  %v2722_v16 = vpop.permute.xlu2 %2721  ;;  %v1334_v32 = vsel %vm418_vm1, %v2704_v13, %v2708_v58 }
 0x328   : > { %v2719_v14 = vunpack.i.h.bf16 %v4032_v22  ;;  %v2718_v0 = vunpack.i.l.bf16 %v4032_v22  ;;  %v2724_v18 = vunpack.i.h.bf16 %v2722_v16  ;;  %v2723_v19 = vunpack.i.l.bf16 %v2722_v16 }
 0x329   : > { %v1391_v59 = vsel %vm440_vm5, %v2733_v43, %v2734_v36  ;;  %1206 = vmatpush.msra.mxu0 %v1025_v53  ;;  %v2559_v53 = vunpack.i.h.bf16 %v3657_v46  ;;  %v2554_v46 = vunpack.i.h.bf16 %v3653_v5  ;;  %v2694_v58 = vunpack.i.h.bf16 %v3879_v42 }
 0x32a   : > { %v4042_v1 = vpack.i.bf16 %v2734_v36, %v1391_v59  ;;  %v1365_v56 = vsel %vm430_vm3, %v2718_v0, %v2719_v14  ;;  %v1007_v36 = vsel %vm556_vm9, %v2428_v41, %v2429_v34  ;;  %v1367_v17 = vsel %vm430_vm3, %v2724_v18, %v2728_v20 }
 0x32b   : > { %v4050_v4 = vpack.i.bf16 %v2719_v14, %v1365_v56  ;;  %1207 = vmatpush.msra.mxu0 %v1022_v51  ;;  %v2703_v20 = vunpack.i.l.bf16 %v2702_v44  ;;  %v2713_v34 = vunpack.i.l.bf16 %v3958_v35  ;;  %v2693_v44 = vunpack.i.l.bf16 %v3879_v42 }
 0x32c   : > { %v1331_v16 = vsel %vm418_vm1, %v2694_v58, %v2698_v2  ;;  %v2674_v22 = vunpack.i.h.bf16 %v3814_v28 }
 0x32d   : > { %1208 = vmatpush.msra.mxu0 %v1019_v63  ;;  %v1390_v63 = vsel %vm440_vm5, %v2554_v46, %v2733_v43 }
 0x32e   : > { %v4057_v24 = vpop.permute.xlu0 %2756 }
 0x32f   : > { %1209 = vmatpush.msra.mxu0 %v1016_v49  ;;  %v4062_v48 = vpop.permute.xlu1 %2736  ;;  %v2714_v49 = vunpack.i.h.bf16 %v3958_v35  ;;  %v4133_v2 = vpop.permute.xlu2 %2746 }
 0x330   : > { %v2739_v12 = vunpack.i.h.bf16 %v4062_v48  ;;  %v2738_v60 = vunpack.i.l.bf16 %v4062_v48  ;;  %v4854_v48 = vunpack.i.h.bf16 %v4133_v2 }
 0x331   : > { %1210 = vmatpush.msra.mxu0 %v1013_v61  ;;  %v2790_v61 = vpack.i.bf16 %v1390_v63, %v2554_v46  ;;  %v1363_v5 = vsel %vm430_vm3, %v2713_v34, %v2714_v49  ;;  %v1364_v45 = vsel %vm430_vm3, %v2714_v49, %v2718_v0  ;;  %v2673_v0 = vunpack.i.l.bf16 %v3814_v28 }
 0x332   : > { %v1392_v15 = vsel %vm440_vm5, %v2738_v60, %v2739_v12  ;;  %v2800_v43 = vpack.i.bf16 %v1364_v45, %v1363_v5 }
 0x333   : > { %v2785_v33 = vpack.i.bf16 %v1392_v15, %v2738_v60  ;;  %1211 = vmatpush.msra.mxu0 %v1010_v26  ;;  %v1333_v60 = vsel %vm418_vm1, %v2703_v20, %v2704_v13  ;;  %v1330_v26 = vsel %vm418_vm1, %v2693_v44, %v2694_v58  ;;  %v4124_v42 = vsel %vm406_vm2, %v2673_v0, %v2674_v22 }
 0x334   : > { %v2815_v15 = vpack.i.bf16 %v1334_v32, %v1333_v60 }
 0x335   : > { %1212 = vmatpush.msra.mxu0 %v1007_v36  ;;  %2786 = vrot.lane.b32.xlu0 %v2785_v33, %s3156_s27  ;;  %v2825_v33 = vpack.i.bf16 %v1331_v16, %v1330_v26 }
 0x336   : > { %v4080_v21 = vpop.permute.xlu0 %2761  ;;  %1213 = vmatmul.f32.vlgmr.msra.gmra.mxu0 %v3924_v3  ;;  %v1366_v3 = vsel %vm430_vm3, %v2723_v19, %v2724_v18  ;;  %v4129_v18 = vsel %vm406_vm2, %v2674_v22, %v2678_v50 }
 0x337   : > { %v4859_v27 = vunpack.i.h.bf16 %v4080_v21  ;;  %v2763_v14 = vunpack.i.l.bf16 %v4080_v21  ;;  %v2742_v8 = vpop.permute.xlu1 %2741  ;;  %v2795_v52 = vpack.i.bf16 %v1367_v17, %v1366_v3  ;;  %v2930_v55 = vpack.i.bf16 %v4129_v18, %v4124_v42  ;;  %v4135_v19 = vpop.permute.xlu2 %2751 }
 0x338   : > { %v2743_v59 = vunpack.i.l.bf16 %v2742_v8  ;;  %v2744_v35 = vunpack.i.h.bf16 %v2742_v8 }
 0x339   : > { %v1488_v41 = vsel %vm476_vm7, %v2763_v14, %v4859_v27 }
 0x33a   : > { %v2810_v29 = vpack.i.bf16 %v1488_v41, %v2763_v14  ;;  %v1414_v56 = vsel %vm449_vm4, %v2559_v53, %v2743_v59  ;;  %v1415_v25 = vsel %vm449_vm4, %v2743_v59, %v2744_v35 }
 0x33b   : > { %v2780_v51 = vpack.i.bf16 %v1414_v56, %v2559_v53  ;;  %v2805_v36 = vpack.i.bf16 %v2744_v35, %v1415_v25 }
 0x33c   : > { %2811 = vrot.lane.b32.xlu2 %v2810_v29, %s3156_s27 }
 0x33d   : > { %2781 = vrot.lane.b32.xlu1 %v2780_v51, %s3156_s27  ;;  %2796 = vrot.lane.b32.xlu0 %v2795_v52, %s3156_s27 }
 0x345   : > { %2791 = vrot.lane.b32.xlu1 %v2790_v61, %s3156_s27  ;;  %2816 = vrot.lane.b32.xlu0 %v2815_v15, %s3156_s27 }
 0x34d   : > { %2801 = vrot.lane.b32.xlu1 %v2800_v43, %s3156_s27  ;;  %2826 = vrot.lane.b32.xlu0 %v2825_v33, %s3156_s27 }
 0x355   : > { %2806 = vrot.lane.b32.xlu1 %v2805_v36, %s3156_s27 }
 0x366   : > { %v4137_v28 = vpop.permute.xlu2 %2776 }
 0x367   : > { %v2779_v14 = vunpack.i.h.bf16 %v4137_v28  ;;  %v2778_v8 = vunpack.i.l.bf16 %v4137_v28 }
 0x369   : > { %v1462_v40 = vsel %vm467_vm8, %v2778_v8, %v2779_v14 }
 0x36a   : > { %v2885_v53 = vpack.i.bf16 %v1462_v40, %v2778_v8 }
 0x36c   : > { %2886 = vrot.lane.b32.xlu0 %v2885_v53, %s3156_s27 }
 0x37e   : > { %v2767_v50 = vpop.permute.xlu1 %2766 }
 0x37f   : > { %v2769_v59 = vunpack.i.h.bf16 %v2767_v50  ;;  %v2768_v17 = vunpack.i.l.bf16 %v2767_v50 }
 0x381   : > { %v1486_v41 = vsel %vm476_vm7, %v2768_v17, %v2769_v59 }
 0x382   : > { %v2820_v29 = vpack.i.bf16 %v1486_v41, %v2768_v17  ;;  %v4178_v17 = vld [vmem:[#allocation2 + $0x40] sm:$0xff] }
 0x384   : > { %2821 = vrot.lane.b32.xlu2 %v2820_v29, %s3156_s27  ;;  %v2753_v29 = vunpack.i.l.bf16 %v4135_v19 }
 0x386   : > { %v4147_v56 = vpop.permute.xlu1 %1472 }
 0x387   : > { %v4151_v3 = vsel %vm476_vm7, %v2769_v59, %v4147_v56 }
 0x388   : > { %v2940_v51 = vpack.i.bf16 %v4147_v56, %v4151_v3 }
 0x394   : > { %v1174_v52 = vpop.f32.mrf.mxu1 }
 0x395   : > { %v1134_v46 = vpop.f32.mrf.mxu3  ;;  %v1154_v13 = vpop.f32.mrf.mxu0  ;;  %v1175_v63 = vadd.f32 %v1174_v52, %v3527_v54  ;;  %v2564_v52 = vunpack.i.h.bf16 %v3661_v7  ;;  %v2754_v7 = vunpack.i.h.bf16 %v4135_v19  ;;  %v2758_v19 = vunpack.i.l.bf16 %v4057_v24 }
 0x396   : > { %v1135_v20 = vadd.f32 %v1134_v46, %v3527_v54 }
 0x397   : > { %v1438_v46 = vsel %vm458_vm6, %v2564_v52, %v2753_v29 }
 0x398   : > { %v1155_v32 = vadd.f32 %v1154_v13, %v1135_v20  ;;  %v1194_v49 = vpop.f32.mrf.mxu2  ;;  %v4194_v13 = vpop.permute.xlu0 %2771  ;;  %v2960_v20 = vpack.i.bf16 %v1438_v46, %v2564_v52 }
 0x399   : > { %v1195_v34 = vadd.f32 %v1194_v49, %v1175_v63  ;;  %v4855_v63 = vunpack.i.h.bf16 %v4194_v13 }
 0x39a   : > { %v1237_v60 = vmax.f32 %v1155_v32, 0.0  ;;  %v2773_v32 = vunpack.i.l.bf16 %v4194_v13 }
 0x39b   : > { %v1238_v61 = vmax.f32 %v1195_v34, 0.0  ;;  %v1439_v34 = vsel %vm458_vm6, %v2753_v29, %v2754_v7 }
 0x39c   : > { %v1240_v15 = vmul.f32 %v1237_v60, %v3549_v6  ;;  %v3015_v60 = vpack.i.bf16 %v2754_v7, %v1439_v34 }
 0x39d   : > { %v1241_v5 = vmul.f32 %v1238_v61, %v3567_v47  ;;  %v4852_v61 = vunpack.i.h.bf16 %v4057_v24 }
 0x39e   : > { %1243 = vst [vmem:[#allocation2 + $0x58] sm:$0xff] %v1240_v15  ;;  %v2830_v45 = vpack.i.bf16 %v1240_v15, %v3708_v30  ;;  %v4181_v41 = vpack.i.bf16 %v1240_v15, %v4178_v17 }
 0x39f   : > { %1244 = vst [vmem:[#allocation2 + $0x60] sm:$0xff] %v1241_v5  ;;  %v2910_v43 = vpack.i.bf16 %v1241_v5, %v1240_v15  ;;  %v1440_v15 = vsel %vm458_vm6, %v2758_v19, %v4852_v61 }
 0x3a0   : > { %2831 = vrot.lane.b32.xlu1 %v2830_v45, %s3149_s20  ;;  %v1234_v16 = vpop.f32.mrf.mxu2  ;;  %v2950_v42 = vpack.i.bf16 %v1440_v15, %v2758_v19 }
 0x3a8   : > { %2841 = vrot.lane.b32.xlu1 %v2830_v45, %s3148_s19 }
 0x3af   : > { %v2782_v58 = vpop.permute.xlu1 %2781 }
 0x3b0   : > { %v2784_v44 = vunpack.i.h.bf16 %v2782_v58  ;;  %v2783_v35 = vunpack.i.l.bf16 %v2782_v58  ;;  %2851 = vrot.lane.b32.xlu1 %v2830_v45, %s3150_s21 }
 0x3b2   : > { %v1758_v25 = vsel %vm556_vm9, %v2783_v35, %v2784_v44 }
 0x3b3   : > { %v1214_v26 = vpop.f32.mrf.mxu0  ;;  %1879 = vmatpush.msrb.mxu3 %v1758_v25 }
 0x3b4   : > { %v1215_v33 = vadd.f32 %v1214_v26, %v3527_v54 }
 0x3b6   : > { %v1235_v22 = vadd.f32 %v1234_v16, %v1215_v33 }
 0x3b7   : > { %v4165_v30 = vpop.permute.xlu1 %2791 }
 0x3b8   : > { %v1239_v0 = vmax.f32 %v1235_v22, 0.0 }
 0x3ba   : > { %v1242_v36 = vmul.f32 %v1239_v0, %v3575_v57  ;;  %v2689_v0 = vunpack.i.h.bf16 %v3843_v31 }
 0x3bc   : > { %1245 = vst.msk [vmem:[#allocation2 + $0x68] sm:$0xff] %vm364_vm0, %v1242_v36  ;;  %v1302_v28 = vsel %vm406_vm2, %v2688_v9, %v2689_v0 }
 0x3bd   : > { %v3010_v29 = vpack.i.bf16 %v2689_v0, %v1302_v28 }
 0x3bf   : > { %v4169_v8 = vpop.permute.xlu1 %2801 }
 0x3c3   : > { %v1260_v40 = vld [vmem:[#allocation2 + $0x68] sm:$0xff] }
 0x3c4   : > { %v4171_v53 = vpack.i.bf16 %v1260_v40, %v1241_v5  ;;  %v4239_v56 = vpack.i.bf16 %v4178_v17, %v1260_v40 }
 0x3c6   : > { %2891 = vrot.lane.b32.xlu0 %v4171_v53, %s3151_s22  ;;  %2836 = vrot.lane.b32.xlu2 %v4171_v53, %s3149_s20 }
 0x3c7   : > { %v2807_v54 = vpop.permute.xlu1 %2806 }
 0x3c8   : > { %v2808_v50 = vunpack.i.l.bf16 %v2807_v54 }
 0x3ca   : > { %v1759_v59 = vsel %vm556_vm9, %v2784_v44, %v2808_v50 }
 0x3cb   : > { %1919 = vmatpush.msra.mxu1 %v1759_v59 }
 0x3ce   : > { %2846 = vrot.lane.b32.xlu2 %v4171_v53, %s3148_s19  ;;  %2896 = vrot.lane.b32.xlu0 %v4181_v41, %s3152_s23 }
 0x3d6   : > { %2856 = vrot.lane.b32.xlu2 %v4171_v53, %s3150_s21  ;;  %2936 = vrot.lane.b32.xlu0 %v4010_v11, %s3156_s27  ;;  %v1464_v11 = vsel %vm467_vm8, %v2773_v32, %v4855_v63 }
 0x3d7   : > { %v2875_v49 = vpack.i.bf16 %v1464_v11, %v2773_v32 }
 0x3de   : > { %2961 = vrot.lane.b32.xlu0 %v2960_v20, %s3156_s27  ;;  %2861 = vrot.lane.b32.xlu2 %v4181_v41, %s3151_s22 }
 0x3e6   : > { %2966 = vrot.lane.b32.xlu0 %v4171_v53, %s3153_s24  ;;  %2876 = vrot.lane.b32.xlu2 %v2875_v49, %s3156_s27 }
 0x3ee   : > { %2986 = vrot.lane.b32.xlu0 %v3934_v39, %s3156_s27  ;;  %2911 = vrot.lane.b32.xlu2 %v2910_v43, %s3155_s26  ;;  %v1449_v39 = vpop.permute.xlu0 %1448 }
 0x3ef   : > { %v1463_v44 = vsel %vm467_vm8, %v2779_v14, %v1449_v39 }
 0x3f0   : > { %v2990_v16 = vpack.i.bf16 %v1449_v39, %v1463_v44 }
 0x3f6   : > { %2996 = vrot.lane.b32.xlu0 %v4018_v62, %s3156_s27  ;;  %2916 = vrot.lane.b32.xlu2 %v2910_v43, %s3154_s25  ;;  %v2809_v62 = vunpack.i.h.bf16 %v2807_v54  ;;  %v4230_v5 = vpop.permute.xlu0 %2786 }
 0x3f8   : > { %v1760_v18 = vsel %vm556_vm9, %v2808_v50, %v2809_v62 }
 0x3f9   : > { %1959 = vmatpush.msrb.mxu0 %v1760_v18 }
 0x3fe   : > { %3016 = vrot.lane.b32.xlu0 %v3015_v60, %s3156_s27  ;;  %2931 = vrot.lane.b32.xlu2 %v2930_v55, %s3156_s27  ;;  %v4233_v55 = vpop.permute.xlu2 %2811 }
 0x406   : > { %3021 = vrot.lane.b32.xlu0 %v2830_v45, %s3156_s27  ;;  %2941 = vrot.lane.b32.xlu2 %v2940_v51, %s3156_s27  ;;  %v4236_v45 = vpop.permute.xlu0 %2796  ;;  %v4243_v3 = vpop.permute.xlu2 %2821 }
 0x40e   : > { %2951 = vrot.lane.b32.xlu2 %v2950_v42, %s3156_s27  ;;  %v4245_v43 = vpop.permute.xlu0 %2816 }
 0x412   : > { %v2832_v51 = vpop.permute.xlu1 %2831 }
 0x413   : > { %v2834_v20 = vunpack.i.h.bf16 %v2832_v51  ;;  %v2833_v31 = vunpack.i.l.bf16 %v2832_v51 }
 0x415   : > { %v1303_v11 = vsel %vm406_vm2, %v2833_v31, %v2834_v20 }
 0x416   : > { %2971 = vrot.lane.b32.xlu2 %v4239_v56, %s3154_s25  ;;  %v4256_v36 = vpop.permute.xlu0 %2826 }
 0x41a   : > { %v2842_v22 = vpop.permute.xlu1 %2841 }
 0x41b   : > { %v2843_v40 = vunpack.i.l.bf16 %v2842_v22 }
 0x41e   : > { %2981 = vrot.lane.b32.xlu2 %v3712_v23, %s3156_s27  ;;  %v2844_v23 = vunpack.i.h.bf16 %v2842_v22  ;;  %v4271_v46 = vpop.permute.xlu0 %2886 }
 0x420   : > { %v2837_v58 = vpop.permute.xlu2 %2836  ;;  %v1336_v50 = vsel %vm418_vm1, %v2843_v40, %v2844_v23 }
 0x421   : > { %v2839_v35 = vunpack.i.h.bf16 %v2837_v58  ;;  %v2838_v25 = vunpack.i.l.bf16 %v2837_v58 }
 0x422   : > { %v2852_v51 = vpop.permute.xlu1 %2851 }
 0x423   : > { %v1305_v26 = vsel %vm406_vm2, %v2838_v25, %v2839_v35  ;;  %v1304_v9 = vsel %vm406_vm2, %v2834_v20, %v2838_v25 }
 0x424   : > { %v4253_v33 = vpack.i.bf16 %v2839_v35, %v1305_v26  ;;  %v3055_v49 = vpack.i.bf16 %v1304_v9, %v1303_v11  ;;  %v2854_v26 = vunpack.i.h.bf16 %v2852_v51 }
 0x426   : > { %2991 = vrot.lane.b32.xlu2 %v2990_v16, %s3156_s27  ;;  %v2853_v16 = vunpack.i.l.bf16 %v2852_v51 }
 0x428   : > { %v4259_v54 = vpop.permute.xlu2 %2846  ;;  %v1369_v40 = vsel %vm430_vm3, %v2853_v16, %v2854_v26 }
 0x429   : > { %v2848_v14 = vunpack.i.l.bf16 %v4259_v54 }
 0x42b   : > { %v1337_v59 = vsel %vm418_vm1, %v2844_v23, %v2848_v14 }
 0x42c   : > { %v3040_v52 = vpack.i.bf16 %v1337_v59, %v1336_v50 }
 0x42e   : > { %3011 = vrot.lane.b32.xlu2 %v3010_v29, %s3156_s27  ;;  %3041 = vrot.lane.b32.xlu0 %v3040_v52, %s3156_s27 }
 0x430   : > { %v2857_v32 = vpop.permute.xlu2 %2856 }
 0x431   : > { %v2858_v25 = vunpack.i.l.bf16 %v2857_v32 }
 0x436   : > { %3056 = vrot.lane.b32.xlu0 %v3055_v49, %s3156_s27  ;;  %v4888_v49 = vpack.i.bf16 %v3861_v10, %v3856_v37 }
 0x438   : > { %v2892_v7 = vpop.permute.xlu0 %2891  ;;  %v2862_v34 = vpop.permute.xlu2 %2861 }
 0x439   : > { %v2894_v60 = vunpack.i.h.bf16 %v2892_v7  ;;  %v2893_v39 = vunpack.i.l.bf16 %v2892_v7  ;;  %v2864_v19 = vunpack.i.h.bf16 %v2862_v34  ;;  %v2863_v62 = vunpack.i.l.bf16 %v2862_v34 }
 0x43b   : > { %v1395_v15 = vsel %vm440_vm5, %v2893_v39, %v2894_v60  ;;  %v1394_v42 = vsel %vm440_vm5, %v2864_v19, %v2893_v39  ;;  %v1393_v18 = vsel %vm440_vm5, %v2739_v12, %v2863_v62  ;;  %v1370_v12 = vsel %vm430_vm3, %v2854_v26, %v2858_v25 }
 0x43c   : > { %v4281_v58 = vpack.i.bf16 %v2894_v60, %v1395_v15  ;;  %v3025_v44 = vpack.i.bf16 %v1394_v42, %v2864_v19  ;;  %v2865_v35 = vpack.i.bf16 %v2863_v62, %v1393_v18  ;;  %v3030_v50 = vpack.i.bf16 %v1370_v12, %v1369_v40 }
 0x43d   : > { %v2859_v62 = vunpack.i.h.bf16 %v2857_v32  ;;  %v2849_v18 = vunpack.i.h.bf16 %v4259_v54 }
 0x43e   : > { %3026 = vrot.lane.b32.xlu2 %v3025_v44, %s3156_s27  ;;  %2866 = vrot.lane.b32.xlu1 %v2865_v35, %s3156_s27 }
 0x43f   : > { %v1371_v10 = vsel %vm430_vm3, %v2858_v25, %v2859_v62  ;;  %v1338_v44 = vsel %vm418_vm1, %v2848_v14, %v2849_v18 }
 0x440   : > { %v4285_v22 = vpop.permute.xlu0 %2896  ;;  %v4287_v0 = vpop.permute.xlu2 %2876  ;;  %v3065_v42 = vpack.i.bf16 %v2859_v62, %v1371_v10  ;;  %v3080_v35 = vpack.i.bf16 %v2849_v18, %v1338_v44  ;;  %v4849_v10 = vunpack.i.h.bf16 %v4230_v5 }
 0x441   : > { %v2898_v23 = vunpack.i.l.bf16 %v4285_v22 }
 0x443   : > { %v1417_v28 = vsel %vm449_vm4, %v4854_v48, %v2898_v23 }
 0x444   : > { %v4296_v59 = vpack.i.bf16 %v2898_v23, %v1417_v28 }
 0x446   : > { %2871 = vrot.lane.b32.xlu1 %v4042_v1, %s3156_s27  ;;  %3031 = vrot.lane.b32.xlu2 %v3030_v50, %s3156_s27 }
 0x448   : > { %v4301_v29 = vpop.permute.xlu0 %2936  ;;  %v4303_v52 = vpop.permute.xlu2 %2911 }
 0x449   : > { %v4858_v20 = vunpack.i.h.bf16 %v4303_v52  ;;  %v2913_v31 = vunpack.i.l.bf16 %v4303_v52  ;;  %v4892_v57 = vunpack.i.h.bf16 %v4303_v52 }
 0x44b   : > { %v1490_v9 = vsel %vm476_vm7, %v2913_v31, %v4858_v20 }
 0x44c   : > { %v3035_v11 = vpack.i.bf16 %v1490_v9, %v2913_v31 }
 0x44e   : > { %2881 = vrot.lane.b32.xlu1 %v4888_v49, %s3156_s27  ;;  %3036 = vrot.lane.b32.xlu2 %v3035_v11, %s3156_s27  ;;  %v4860_v49 = vunpack.i.h.bf16 %v4271_v46 }
 0x450   : > { %v4315_v1 = vpop.permute.xlu0 %2961  ;;  %v2917_v7 = vpop.permute.xlu2 %2916 }
 0x451   : > { %v2919_v34 = vunpack.i.h.bf16 %v2917_v7  ;;  %v2918_v60 = vunpack.i.l.bf16 %v2917_v7  ;;  %v4845_v40 = vunpack.i.h.bf16 %v4315_v1 }
 0x453   : > { %v1466_v39 = vsel %vm467_vm8, %v2918_v60, %v2919_v34 }
 0x454   : > { %v3050_v19 = vpack.i.bf16 %v1466_v39, %v2918_v60 }
 0x456   : > { %2901 = vrot.lane.b32.xlu1 %v4171_v53, %s3152_s23  ;;  %3051 = vrot.lane.b32.xlu2 %v3050_v19, %s3156_s27 }
 0x458   : > { %v4321_v15 = vpop.permute.xlu0 %2966  ;;  %v4323_v37 = vpop.permute.xlu2 %2931 }
 0x459   : > { %v2969_v26 = vunpack.i.h.bf16 %v4321_v15  ;;  %v4851_v25 = vunpack.i.l.bf16 %v4321_v15 }
 0x45b   : > { %v1443_v54 = vsel %vm458_vm6, %v4851_v25, %v2969_v26  ;;  %v2818_v25 = vunpack.i.l.bf16 %v4245_v43 }
 0x45c   : > { %v3095_v12 = vpack.i.bf16 %v2969_v26, %v1443_v54  ;;  %v2793_v26 = vunpack.i.l.bf16 %v4165_v30 }
 0x45e   : > { %2906 = vrot.lane.b32.xlu1 %v4181_v41, %s3153_s24  ;;  %3066 = vrot.lane.b32.xlu2 %v3065_v42, %s3156_s27  ;;  %v2788_v42 = vunpack.i.l.bf16 %v4230_v5 }
 0x460   : > { %v4330_v32 = vpop.permute.xlu0 %2986  ;;  %v4332_v51 = vpop.permute.xlu2 %2941 }
 0x466   : > { %2921 = vrot.lane.b32.xlu1 %v4239_v56, %s3155_s26  ;;  %3081 = vrot.lane.b32.xlu2 %v3080_v35, %s3156_s27  ;;  %v4848_v35 = vunpack.i.h.bf16 %v4165_v30 }
 0x468   : > { %v4342_v41 = vpop.permute.xlu0 %2996  ;;  %v4344_v16 = vpop.permute.xlu2 %2951 }
 0x46e   : > { %3096 = vrot.lane.b32.xlu2 %v3095_v12, %s3156_s27  ;;  %v1752_v12 = vsel %vm556_vm9, %v2788_v42, %v4849_v10  ;;  %v4857_v42 = vunpack.i.h.bf16 %v4169_v8 }
 0x470   : > { %v4350_v14 = vpop.permute.xlu0 %3016  ;;  %v4352_v23 = vpop.permute.xlu2 %2971 }
 0x471   : > { %v4846_v56 = vunpack.i.l.bf16 %v4350_v14  ;;  %v2973_v28 = vunpack.i.l.bf16 %v4352_v23  ;;  %v2974_v52 = vunpack.i.h.bf16 %v4352_v23 }
 0x473   : > { %v1467_v50 = vsel %vm467_vm8, %v2919_v34, %v2973_v28  ;;  %v4363_v31 = vsel %vm556_vm9, %v4845_v40, %v4846_v56  ;;  %v4856_v56 = vunpack.i.h.bf16 %v4236_v45 }
 0x474   : > { %v4365_v9 = vpack.i.bf16 %v2973_v28, %v1467_v50  ;;  %v1749_v28 = vsel %vm556_vm9, %v2793_v26, %v4848_v35 }
 0x478   : > { %v4367_v11 = vpop.permute.xlu2 %2981  ;;  %v4382_v19 = vpop.permute.xlu0 %3021 }
 0x480   : > { %v4370_v7 = vpop.permute.xlu2 %2991 }
 0x481   : > { %v4847_v60 = vunpack.i.l.bf16 %v4370_v7 }
 0x483   : > { %v4378_v34 = vsel %vm556_vm9, %v4860_v49, %v4847_v60  ;;  %v2798_v60 = vunpack.i.l.bf16 %v4236_v45 }
 0x485   : > { %v1743_v10 = vsel %vm556_vm9, %v2798_v60, %v4856_v56  ;;  %v2828_v60 = vunpack.i.l.bf16 %v4256_v36 }
 0x488   : > { %v4380_v39 = vpop.permute.xlu2 %3011 }
 0x498   : > { %v4384_v62 = vpop.permute.xlu2 %3026 }
 0x499   : > { %v4850_v18 = vunpack.i.h.bf16 %v4384_v62  ;;  %v3028_v44 = vunpack.i.l.bf16 %v4384_v62 }
 0x49b   : > { %v1755_v54 = vsel %vm556_vm9, %v3028_v44, %v4850_v18  ;;  %v4861_v18 = vunpack.i.h.bf16 %v4245_v43 }
 0x49c   : > { %1880 = vmatpush.msrb.mxu3 %v1755_v54 }
 0x49d   : > { %v1734_v20 = vsel %vm556_vm9, %v2818_v25, %v4861_v18 }
 0x49e   : > { %1881 = vmatpush.msrb.mxu3 %v1752_v12  ;;  %v2803_v12 = vunpack.i.l.bf16 %v4169_v8 }
 0x4a0   : > { %1882 = vmatpush.msrb.mxu3 %v1749_v28  ;;  %v4401_v50 = vpop.permute.xlu2 %3031  ;;  %v4403_v40 = vpop.permute.xlu0 %3041  ;;  %v1740_v61 = vsel %vm556_vm9, %v2803_v12, %v4857_v42  ;;  %v4862_v42 = vunpack.i.h.bf16 %v4243_v3 }
 0x4a1   : > { %v4853_v44 = vunpack.i.h.bf16 %v4401_v50  ;;  %v3033_v54 = vunpack.i.l.bf16 %v4401_v50  ;;  %v4867_v28 = vunpack.i.h.bf16 %v4403_v40  ;;  %v3043_v35 = vunpack.i.l.bf16 %v4403_v40 }
 0x4a3   : > { %v1746_v26 = vsel %vm556_vm9, %v3033_v54, %v4853_v44  ;;  %v4865_v44 = vunpack.i.h.bf16 %v4256_v36  ;;  %v1737_v12 = vsel %vm556_vm9, %v3043_v35, %v4867_v28  ;;  %v4872_v28 = vunpack.i.h.bf16 %v4382_v19 }
 0x4a4   : > { %1883 = vmatpush.msrb.mxu3 %v1746_v26  ;;  %v2813_v26 = vunpack.i.l.bf16 %v4233_v55 }
 0x4a5   : > { %v1731_v35 = vsel %vm556_vm9, %v2828_v60, %v4865_v44  ;;  %v4868_v60 = vunpack.i.h.bf16 %v4287_v0  ;;  %v2933_v44 = vunpack.i.l.bf16 %v4323_v37 }
 0x4a6   : > { %1884 = vmatpush.msrb.mxu3 %v1743_v10 }
 0x4a8   : > { %v4427_v48 = vpop.permute.xlu2 %3036  ;;  %1885 = vmatpush.msrb.mxu3 %v1740_v61  ;;  %v4429_v63 = vpop.permute.xlu0 %3056  ;;  %v2823_v61 = vunpack.i.l.bf16 %v4243_v3 }
 0x4a9   : > { %v4863_v56 = vunpack.i.h.bf16 %v4427_v48  ;;  %v3038_v10 = vunpack.i.l.bf16 %v4427_v48  ;;  %v4864_v27 = vunpack.i.h.bf16 %v4429_v63  ;;  %v3058_v49 = vunpack.i.l.bf16 %v4429_v63 }
 0x4aa   : > { %1886 = vmatpush.msrb.mxu3 %v1737_v12  ;;  %v4889_v12 = vunpack.i.h.bf16 %v4233_v55 }
 0x4ab   : > { %v1791_v54 = vsel %vm556_vm9, %v3038_v10, %v4863_v56  ;;  %v1728_v18 = vsel %vm556_vm9, %v3058_v49, %v4864_v27  ;;  %v1785_v10 = vsel %vm556_vm9, %v2823_v61, %v4862_v42  ;;  %v2888_v49 = vunpack.i.l.bf16 %v4271_v46 }
 0x4ac   : > { %1887 = vmatpush.msrb.mxu3 %v1734_v20  ;;  %1904 = vmatpush.msrb.mxu2 %v1791_v54  ;;  %v1788_v25 = vsel %vm556_vm9, %v2813_v26, %v4889_v12  ;;  %v2878_v26 = vunpack.i.l.bf16 %v4287_v0  ;;  %v4871_v56 = vunpack.i.h.bf16 %v4323_v37 }
 0x4ae   : > { %1888 = vmatpush.msrb.mxu3 %v1731_v35  ;;  %1905 = vmatpush.msrb.mxu2 %v1788_v25  ;;  %v4890_v25 = vunpack.i.h.bf16 %v4271_v46 }
 0x4b0   : > { %v4459_v20 = vpop.permute.xlu1 %2866  ;;  %v4461_v54 = vpop.permute.xlu2 %3051  ;;  %1889 = vmatpush.msrb.mxu3 %v1728_v18  ;;  %1906 = vmatpush.msrb.mxu2 %v1785_v10  ;;  %v1779_v18 = vsel %vm556_vm9, %v2878_v26, %v4868_v60  ;;  %v1776_v10 = vsel %vm556_vm9, %v2888_v49, %v4890_v25  ;;  %v3023_v26 = vunpack.i.l.bf16 %v4382_v19 }
 0x4b1   : > { %v4866_v35 = vunpack.i.h.bf16 %v4461_v54  ;;  %v3053_v12 = vunpack.i.l.bf16 %v4461_v54 }
 0x4b3   : > { %v1782_v61 = vsel %vm556_vm9, %v3053_v12, %v4866_v35  ;;  %v4870_v12 = vunpack.i.l.bf16 %v4380_v39 }
 0x4b4   : > { %1907 = vmatpush.msrb.mxu2 %v1782_v61 }
 0x4b6   : > { %1908 = vmatpush.msrb.mxu2 %v1779_v18  ;;  %v1722_v18 = vsel %vm556_vm9, %v2933_v44, %v4871_v56 }
 0x4b8   : > { %v4477_v42 = vpop.permute.xlu1 %2871  ;;  %1909 = vmatpush.msrb.mxu2 %v1776_v10  ;;  %v2899_v10 = vunpack.i.h.bf16 %v4285_v22  ;;  %v4891_v22 = vunpack.i.h.bf16 %v4080_v21  ;;  %v3135_v21 = vld [vmem:[#allocation2] sm:$0xff] }
 0x4c0   : > { %v2882_v27 = vpop.permute.xlu1 %2881 }
 0x4c1   : > { %v2884_v61 = vunpack.i.h.bf16 %v2882_v27  ;;  %v2883_v35 = vunpack.i.l.bf16 %v2882_v27  ;;  %v1719_v27 = vsel %vm556_vm9, %v3023_v26, %v4872_v28 }
 0x4c3   : > { %v1725_v46 = vsel %vm556_vm9, %v2883_v35, %v2884_v61  ;;  %v4488_v49 = vsel %vm556_vm9, %v2884_v61, %v4870_v12 }
 0x4c4   : > { %1890 = vmatpush.msrb.mxu3 %v1725_v46 }
 0x4c6   : > { %1891 = vmatpush.msrb.mxu3 %v1722_v18  ;;  %v3134_v18 = vld [vmem:[#allocation2 + $0x38] sm:$0xff] }
 0x4c7   : > { %v3120_v56 = vpack.i.bf16 %v4178_v17, %v3134_v18  ;;  %v3136_v17 = vld [vmem:[#allocation2 + $0x30] sm:$0xff]  ;;  %v3138_v18 = vld [vmem:[#allocation2 + $0x18] sm:$0xff] }
 0x4c8   : > { %v2902_v25 = vpop.permute.xlu1 %2901  ;;  %1892 = vmatpush.msrb.mxu3 %v1719_v27 }
 0x4c9   : > { %v2904_v35 = vunpack.i.h.bf16 %v2902_v25  ;;  %v2903_v60 = vunpack.i.l.bf16 %v2902_v25 }
 0x4cb   : > { %v1419_v47 = vsel %vm449_vm4, %v2903_v60, %v2904_v35  ;;  %v1418_v61 = vsel %vm449_vm4, %v2899_v10, %v2903_v60  ;;  %v2021_v60 = vld [vmem:[%s4835_s9] sm:$0xff] }
 0x4cc   : > { %v3115_v46 = vpack.i.bf16 %v2904_v35, %v1419_v47  ;;  %v3085_v12 = vpack.i.bf16 %v1418_v61, %v2899_v10 }
 0x4ce   : > { %3116 = vrot.lane.b32.xlu2 %v3115_v46, %s3156_s27  ;;  %v3137_v46 = vld [vmem:[#allocation2 + $0x10] sm:$0xff] }
 0x4d0   : > { %v2907_v44 = vpop.permute.xlu1 %2906 }
 0x4d6   : > { %3121 = vrot.lane.b32.xlu2 %v3120_v56, %s3156_s27  ;;  %v4893_v56 = vunpack.i.h.bf16 %v4194_v13  ;;  %v4895_v13 = vunpack.i.h.bf16 %v4057_v24  ;;  %v1248_v24 = vld [vmem:[%s4833_s7] sm:$0xff] }
 0x4d8   : > { %v2922_v26 = vpop.permute.xlu1 %2921 }
 0x4d9   : > { %v2924_v27 = vunpack.i.h.bf16 %v2922_v26  ;;  %v2923_v28 = vunpack.i.l.bf16 %v2922_v26  ;;  %v3125_v26 = vpack.i.bf16 %v3138_v18, %v3137_v46  ;;  %v2944_v46 = vunpack.i.h.bf16 %v4332_v51 }
 0x4da   : > { %v2943_v18 = vunpack.i.l.bf16 %v4332_v51  ;;  %v4915_v51 = vunpack.i.h.bf16 %v4461_v54 }
 0x4db   : > { %v1489_v25 = vsel %vm476_vm7, %v4891_v22, %v2924_v27  ;;  %v1491_v47 = vsel %vm476_vm7, %v4892_v57, %v2923_v28  ;;  %v2955_v57 = vpack.i.bf16 %v3136_v17, %v3135_v21 }
 0x4dc   : > { %v2925_v10 = vpack.i.bf16 %v2924_v27, %v1489_v25  ;;  %v3060_v35 = vpack.i.bf16 %v2923_v28, %v1491_v47  ;;  %v1465_v28 = vsel %vm467_vm8, %v4893_v56, %v2974_v52  ;;  %v2908_v27 = vunpack.i.l.bf16 %v2907_v44 }
 0x4dd   : > { %v2975_v61 = vpack.i.bf16 %v2974_v52, %v1465_v28  ;;  %v4575_v28 = vld [vmem:[%s4832_s6] sm:$0xff] }
 0x4de   : > { %2926 = vrot.lane.b32.xlu1 %v2925_v10, %s3156_s27  ;;  %2024 = vperm.xlu2 %2419, %v2021_v60   ;;  %v1441_v22 = vsel %vm458_vm6, %v4895_v13, %v2908_v27 }
 0x4df   : > { %3061 = vrot.lane.b32.xlu0 %v3060_v35, %s3156_s27  ;;  %v3005_v25 = vpack.i.bf16 %v2908_v27, %v1441_v22  ;;  %v2983_v35 = vunpack.i.l.bf16 %v4367_v11 }
 0x4e6   : > { %2946 = vrot.lane.b32.xlu1 %v4050_v4, %s3156_s27  ;;  %v2748_v4 = vunpack.i.l.bf16 %v4133_v2 }
 0x4e7   : > { %3076 = vrot.lane.b32.xlu0 %v4365_v9, %s3156_s27  ;;  %v4894_v9 = vunpack.i.h.bf16 %v4133_v2  ;;  %v4896_v2 = vunpack.i.l.bf16 %v4321_v15  ;;  %v4553_v15 = vpop.permute.xlu2 %3066 }
 0x4e9   : > { %v1416_v23 = vsel %vm449_vm4, %v2748_v4, %v4894_v9 }
 0x4ee   : > { %2956 = vrot.lane.b32.xlu1 %v2955_v57, %s3156_s27 }
 0x4ef   : > { %3101 = vrot.lane.b32.xlu0 %v4253_v33, %s3156_s27  ;;  %v3000_v33 = vpack.i.bf16 %v1416_v23, %v2748_v4  ;;  %v4565_v17 = vpop.permute.xlu2 %3081 }
 0x4f6   : > { %2976 = vrot.lane.b32.xlu1 %v2975_v61, %s3156_s27 }
 0x4f7   : > { %3106 = vrot.lane.b32.xlu0 %v4171_v53, %s3156_s27  ;;  %v2909_v53 = vunpack.i.h.bf16 %v2907_v44 }
 0x4f9   : > { %v1442_v47 = vsel %vm458_vm6, %v2909_v53, %v4896_v2  ;;  %v1787_v2 = vsel %vm556_vm9, %v2943_v18, %v2944_v46 }
 0x4fa   : > { %v3070_v60 = vpack.i.bf16 %v1442_v47, %v2909_v53  ;;  %v4602_v47 = vpop.permute.xlu2 %3096 }
 0x4fe   : > { %3001 = vrot.lane.b32.xlu1 %v3000_v33, %s3156_s27 }
 0x4ff   : > { %3126 = vrot.lane.b32.xlu0 %v3125_v26, %s3156_s27 }
 0x506   : > { %3006 = vrot.lane.b32.xlu1 %v3005_v25, %s3156_s27 }
 0x50e   : > { %3046 = vrot.lane.b32.xlu1 %v4281_v58, %s3156_s27 }
 0x516   : > { %3071 = vrot.lane.b32.xlu1 %v3070_v60, %s3156_s27  ;;  %v2994_v60 = vunpack.i.h.bf16 %v4370_v7 }
 0x51e   : > { %3086 = vrot.lane.b32.xlu1 %v3085_v12, %s3156_s27 }
 0x526   : > { %3091 = vrot.lane.b32.xlu1 %v3983_v38, %s3156_s27  ;;  %v4875_v38 = vunpack.i.h.bf16 %v4367_v11 }
 0x528   : > { %v1713_v9 = vsel %vm556_vm9, %v2983_v35, %v4875_v38  ;;  %v3099_v35 = vunpack.i.h.bf16 %v4602_v47 }
 0x52e   : > { %3111 = vrot.lane.b32.xlu1 %v4296_v59, %s3156_s27 }
 0x536   : > { %1494 = vperm.xlu1 %2273, %v1248_v24  }
 0x550   : > { %v4551_v58 = vpop.permute.xlu1 %2926 }
 0x551   : > { %v4557_v10 = vpop.permute.xlu0 %3061  ;;  %v2929_v61 = vunpack.i.h.bf16 %v4551_v58  ;;  %v2928_v4 = vunpack.i.l.bf16 %v4551_v58 }
 0x552   : > { %v3064_v57 = vunpack.i.h.bf16 %v4557_v10  ;;  %v3063_v52 = vunpack.i.l.bf16 %v4557_v10  ;;  %v4912_v10 = vunpack.i.h.bf16 %v4233_v55 }
 0x553   : > { %v1790_v22 = vsel %vm556_vm9, %v2928_v4, %v2929_v61  ;;  %v4897_v61 = vunpack.i.l.bf16 %v4370_v7 }
 0x554   : > { %v1793_v26 = vsel %vm556_vm9, %v3063_v52, %v3064_v57 }
 0x558   : > { %v4555_v44 = vpop.permute.xlu1 %2946 }
 0x559   : > { %v4582_v23 = vpop.permute.xlu0 %3076 }
 0x55a   : > { %v3079_v27 = vunpack.i.h.bf16 %v4582_v23  ;;  %v3078_v13 = vunpack.i.l.bf16 %v4582_v23 }
 0x55c   : > { %v1784_v24 = vsel %vm556_vm9, %v3078_v13, %v3079_v27 }
 0x560   : > { %v4559_v12 = vpop.permute.xlu1 %2956 }
 0x561   : > { %v4876_v59 = vunpack.i.h.bf16 %v4559_v12  ;;  %v2958_v21 = vunpack.i.l.bf16 %v4559_v12  ;;  %v4918_v23 = vunpack.i.h.bf16 %v4559_v12  ;;  %v4920_v12 = vunpack.i.l.bf16 %v4602_v47 }
 0x563   : > { %v1716_v56 = vsel %vm556_vm9, %v2958_v21, %v4876_v59  ;;  %v4874_v21 = vunpack.i.l.bf16 %v4602_v47 }
 0x564   : > { %1893 = vmatpush.msrb.mxu3 %v1716_v56 }
 0x565   : > { %v1775_v46 = vsel %vm556_vm9, %v4874_v21, %v3099_v35  ;;  %v4898_v35 = vunpack.i.l.bf16 %v4350_v14  ;;  %v2868_v21 = vunpack.i.l.bf16 %v4459_v20 }
 0x566   : > { %1894 = vmatpush.msrb.mxu3 %v1713_v9  ;;  %v1778_v9 = vsel %vm556_vm9, %v4897_v61, %v2994_v60 }
 0x567   : > { %1895 = vmatmul.f32.vlgmr.msrb.gmra.mxu3 %v4575_v28 }
 0x568   : > { %1984 = vmatpush.msra.mxu3 %v1793_v26  ;;  %v4590_v33 = vpop.permute.xlu1 %2976  ;;  %v4621_v26 = vpop.permute.xlu2 %3116 }
 0x569   : > { %v2979_v25 = vunpack.i.h.bf16 %v4590_v33  ;;  %v2978_v53 = vunpack.i.l.bf16 %v4590_v33  ;;  %v3119_v7 = vunpack.i.h.bf16 %v4621_v26  ;;  %v4877_v60 = vunpack.i.l.bf16 %v4621_v26 }
 0x56a   : > { %1985 = vmatpush.msra.mxu3 %v1790_v22  ;;  %v3019_v22 = vunpack.i.h.bf16 %v4350_v14  ;;  %v4899_v14 = vunpack.i.h.bf16 %v4384_v62  ;;  %v2938_v62 = vunpack.i.l.bf16 %v4301_v29  ;;  %v4919_v33 = vunpack.i.h.bf16 %v4367_v11 }
 0x56b   : > { %v1781_v57 = vsel %vm556_vm9, %v2978_v53, %v2979_v25  ;;  %v1766_v61 = vsel %vm556_vm9, %v4877_v60, %v3119_v7  ;;  %v3068_v7 = vunpack.i.l.bf16 %v4553_v15  ;;  %v4653_v60 = vpop.permute.xlu0 %3101 }
 0x56c   : > { %1986 = vmatpush.msra.mxu3 %v1787_v2 }
 0x56e   : > { %1987 = vmatpush.msra.mxu3 %v1784_v24 }
 0x570   : > { %1988 = vmatpush.msra.mxu3 %v1781_v57  ;;  %v4613_v56 = vpop.permute.xlu1 %3001  ;;  %v1769_v57 = vsel %vm556_vm9, %v4898_v35, %v3019_v22 }
 0x572   : > { %1989 = vmatpush.msra.mxu3 %v1778_v9 }
 0x574   : > { %1990 = vmatpush.msra.mxu3 %v1775_v46  ;;  %v2869_v46 = vunpack.i.h.bf16 %v4459_v20  ;;  %v4900_v20 = vunpack.i.h.bf16 %v4230_v5  ;;  %v2954_v5 = vunpack.i.h.bf16 %v4344_v16 }
 0x578   : > { %v4623_v27 = vpop.permute.xlu1 %3006 }
 0x579   : > { %v3009_v25 = vunpack.i.h.bf16 %v4623_v27  ;;  %v3008_v2 = vunpack.i.l.bf16 %v4623_v27 }
 0x57b   : > { %v1772_v24 = vsel %vm556_vm9, %v3008_v2, %v3009_v25  ;;  %v2874_v25 = vunpack.i.h.bf16 %v4477_v42  ;;  %v1771_v11 = vsel %vm556_vm9, %v2954_v5, %v3008_v2 }
 0x57c   : > { %1991 = vmatpush.msra.mxu3 %v1772_v24  ;;  %v2873_v24 = vunpack.i.l.bf16 %v4477_v42  ;;  %v4901_v42 = vunpack.i.h.bf16 %v4165_v30  ;;  %v2948_v30 = vunpack.i.l.bf16 %v4555_v44 }
 0x57e   : > { %1992 = vmatpush.msra.mxu3 %v1769_v57  ;;  %v3069_v57 = vunpack.i.h.bf16 %v4553_v15  ;;  %v2939_v15 = vunpack.i.h.bf16 %v4301_v29 }
 0x580   : > { %v3047_v9 = vpop.permute.xlu1 %3046  ;;  %1993 = vmatpush.msra.mxu3 %v1766_v61  ;;  %v1753_v61 = vsel %vm556_vm9, %v4900_v20, %v2868_v21  ;;  %v1748_v29 = vsel %vm556_vm9, %v3068_v7, %v3069_v57  ;;  %v2963_v20 = vunpack.i.l.bf16 %v4315_v1 }
 0x581   : > { %v3049_v38 = vunpack.i.h.bf16 %v3047_v9  ;;  %v3048_v59 = vunpack.i.l.bf16 %v3047_v9  ;;  %v1754_v9 = vsel %vm556_vm9, %v2868_v21, %v2869_v46  ;;  %v4902_v21 = vunpack.i.h.bf16 %v4401_v50 }
 0x583   : > { %v1756_v22 = vsel %vm556_vm9, %v4899_v14, %v3048_v59  ;;  %v1757_v35 = vsel %vm556_vm9, %v3048_v59, %v3049_v38  ;;  %v1750_v38 = vsel %vm556_vm9, %v4901_v42, %v2873_v24  ;;  %v1751_v59 = vsel %vm556_vm9, %v2873_v24, %v2874_v25 }
 0x584   : > { %1920 = vmatpush.msra.mxu1 %v1756_v22  ;;  %1960 = vmatpush.msrb.mxu0 %v1757_v35  ;;  %v2953_v14 = vunpack.i.l.bf16 %v4344_v16  ;;  %v1747_v46 = vsel %vm556_vm9, %v4902_v21, %v3068_v7  ;;  %v2949_v24 = vunpack.i.h.bf16 %v4555_v44  ;;  %v3084_v7 = vunpack.i.h.bf16 %v4565_v17 }
 0x585   : > { %v1745_v44 = vsel %vm556_vm9, %v2938_v62, %v2939_v15 }
 0x586   : > { %1921 = vmatpush.msra.mxu1 %v1753_v61  ;;  %1961 = vmatpush.msrb.mxu0 %v1754_v9  ;;  %v3083_v61 = vunpack.i.l.bf16 %v4565_v17  ;;  %v4903_v9 = vunpack.i.h.bf16 %v4236_v45  ;;  %v1770_v57 = vsel %vm556_vm9, %v2953_v14, %v2954_v5  ;;  %v2989_v45 = vunpack.i.h.bf16 %v4330_v32 }
 0x587   : > { %v2998_v17 = vunpack.i.l.bf16 %v4342_v41 }
 0x588   : > { %v4663_v22 = vpop.permute.xlu1 %3071  ;;  %1922 = vmatpush.msra.mxu1 %v1750_v38  ;;  %1962 = vmatpush.msrb.mxu0 %v1751_v59  ;;  %v1744_v42 = vsel %vm556_vm9, %v4903_v9, %v2938_v62  ;;  %v2988_v38 = vunpack.i.l.bf16 %v4330_v32  ;;  %v4904_v59 = vunpack.i.h.bf16 %v4169_v8  ;;  %v4905_v62 = vunpack.i.h.bf16 %v4315_v1  ;;  %v3107_v32 = vpop.permute.xlu0 %3106 }
 0x589   : > { %v3074_v35 = vunpack.i.h.bf16 %v4663_v22  ;;  %v3073_v25 = vunpack.i.l.bf16 %v4663_v22  ;;  %v2999_v8 = vunpack.i.h.bf16 %v4342_v41 }
 0x58a   : > { %1923 = vmatpush.msra.mxu1 %v1747_v46  ;;  %1963 = vmatpush.msrb.mxu0 %v1748_v29  ;;  %v1741_v21 = vsel %vm556_vm9, %v4904_v59, %v2948_v30  ;;  %v1742_v46 = vsel %vm556_vm9, %v2948_v30, %v2949_v24  ;;  %v1767_v15 = vsel %vm556_vm9, %v2963_v20, %v4905_v62  ;;  %v3103_v29 = vunpack.i.l.bf16 %v4653_v60 }
 0x58b   : > { %v1773_v50 = vsel %vm556_vm9, %v3073_v25, %v3074_v35  ;;  %v4906_v25 = vunpack.i.h.bf16 %v4403_v40  ;;  %v1739_v30 = vsel %vm556_vm9, %v3083_v61, %v3084_v7  ;;  %v4907_v24 = vunpack.i.h.bf16 %v4245_v43 }
 0x58c   : > { %1910 = vmatpush.msrb.mxu2 %v1773_v50  ;;  %1924 = vmatpush.msra.mxu1 %v1744_v42  ;;  %v3004_v20 = vunpack.i.h.bf16 %v4613_v56  ;;  %v3003_v40 = vunpack.i.l.bf16 %v4613_v56  ;;  %v3104_v42 = vunpack.i.h.bf16 %v4653_v60  ;;  %v1733_v59 = vsel %vm556_vm9, %v2998_v17, %v2999_v8  ;;  %v4724_v60 = vld [vmem:[%s4832_s6 + $0x8] sm:$0xff] }
 0x58d   : > { %1964 = vmatpush.msrb.mxu0 %v1745_v44  ;;  %v1738_v14 = vsel %vm556_vm9, %v4906_v25, %v3083_v61  ;;  %v1735_v1 = vsel %vm556_vm9, %v4907_v24, %v2988_v38  ;;  %v1736_v44 = vsel %vm556_vm9, %v2988_v38, %v2989_v45  ;;  %v4908_v61 = vunpack.i.h.bf16 %v4256_v36  ;;  %v3122_v25 = vpop.permute.xlu2 %3121 }
 0x58e   : > { %1911 = vmatpush.msrb.mxu2 %v1770_v57  ;;  %1925 = vmatpush.msra.mxu1 %v1741_v21  ;;  %v3014_v57 = vunpack.i.h.bf16 %v4380_v39  ;;  %v1761_v38 = vsel %vm556_vm9, %v3003_v40, %v3004_v20  ;;  %v4909_v36 = vunpack.i.h.bf16 %v4429_v63  ;;  %v1730_v45 = vsel %vm556_vm9, %v3103_v29, %v3104_v42 }
 0x58f   : > { %1965 = vmatpush.msrb.mxu0 %v1742_v46  ;;  %v1732_v7 = vsel %vm556_vm9, %v4908_v61, %v2998_v17  ;;  %v4910_v46 = vunpack.i.h.bf16 %v4427_v48  ;;  %v4911_v63 = vunpack.i.l.bf16 %v4380_v39  ;;  %v1789_v48 = vsel %vm556_vm9, %v4912_v10, %v2928_v4  ;;  %v2012_v10 = vld [vmem:[#allocation2 + $0x38] sm:$0xff] }
 0x590   : > { %v4701_v50 = vpop.permute.xlu1 %3086  ;;  %1912 = vmatpush.msrb.mxu2 %v1767_v15  ;;  %1926 = vmatpush.msra.mxu1 %v1738_v14  ;;  %v1729_v21 = vsel %vm556_vm9, %v4909_v36, %v3103_v29  ;;  %v3108_v14 = vunpack.i.l.bf16 %v3107_v32  ;;  %v4913_v39 = vunpack.i.h.bf16 %v4243_v3  ;;  %v4914_v24 = vunpack.i.h.bf16 %v4323_v37 }
 0x591   : > { %v3089_v9 = vunpack.i.h.bf16 %v4701_v50  ;;  %v3088_v41 = vunpack.i.l.bf16 %v4701_v50  ;;  %1966 = vmatpush.msrb.mxu0 %v1739_v30  ;;  %v1792_v17 = vsel %vm556_vm9, %v4910_v46, %v3063_v52  ;;  %v1727_v15 = vsel %vm556_vm9, %v4911_v63, %v3014_v57  ;;  %v3127_v30 = vpop.permute.xlu0 %3126  ;;  %v2011_v50 = vld [vmem:[#allocation2 + $0x30] sm:$0xff] }
 0x592   : > { %1927 = vmatpush.msra.mxu1 %v1735_v1  ;;  %v3109_v52 = vunpack.i.h.bf16 %v3107_v32  ;;  %v3124_v58 = vunpack.i.h.bf16 %v3122_v25  ;;  %v3129_v55 = vunpack.i.h.bf16 %v3127_v30  ;;  %v3128_v4 = vunpack.i.l.bf16 %v3127_v30  ;;  %v2010_v30 = vld [vmem:[#allocation2 + $0x18] sm:$0xff] }
 0x593   : > { %1967 = vmatpush.msrb.mxu0 %v1736_v44  ;;  %v1764_v43 = vsel %vm556_vm9, %v3088_v41, %v3089_v9  ;;  %v3123_v41 = vunpack.i.l.bf16 %v3122_v25  ;;  %v1783_v3 = vsel %vm556_vm9, %v4915_v51, %v3078_v13  ;;  %v4917_v42 = vunpack.i.h.bf16 %v4287_v0 }
 0x594   : > { %1913 = vmatpush.msrb.mxu2 %v1764_v43  ;;  %1928 = vmatpush.msra.mxu1 %v1732_v7  ;;  %v1721_v32 = vsel %vm556_vm9, %v3108_v14, %v3109_v52  ;;  %v1715_v43 = vsel %vm556_vm9, %v3128_v4, %v3129_v55  ;;  %v1714_v0 = vsel %vm556_vm9, %v4919_v33, %v3128_v4  ;;  %v2013_v52 = vld [vmem:[#allocation2 + $0x40] sm:$0xff] }
 0x595   : > { %1968 = vmatpush.msrb.mxu0 %v1733_v59  ;;  %v1780_v44 = vsel %vm556_vm9, %v4917_v42, %v2978_v53  ;;  %v1717_v54 = vsel %vm556_vm9, %v4918_v23, %v3123_v41  ;;  %v1774_v53 = vsel %vm556_vm9, %v3074_v35, %v4920_v12  ;;  %v2014_v35 = vld [vmem:[#allocation2 + $0x58] sm:$0xff] }
 0x596   : > { %1914 = vmatpush.msrb.mxu2 %v1761_v38  ;;  %1929 = vmatpush.msra.mxu1 %v1729_v21  ;;  %v4922_v21 = vld [vmem:[#allocation4_spill] sm:$0xff] }
 0x597   : > { %1969 = vmatpush.msrb.mxu0 %v1730_v45  ;;  %2165 = vmatmul.msk.f32.vlgmr.msrb.gmra.mxu2 %vm1875_vm12, %v4724_v60 }
 0x598   : > { %1944 = vmatpush.msra.mxu2 %v1792_v17  ;;  %v3092_v62 = vpop.permute.xlu1 %3091  ;;  %1930 = vmatpush.msra.mxu1 %v4488_v49  ;;  %v1786_v49 = vsel %vm556_vm9, %v4913_v39, %v2943_v18  ;;  %v4916_v18 = vunpack.i.h.bf16 %v4382_v19  ;;  %v1718_v19 = vsel %vm556_vm9, %v3123_v41, %v3124_v58  ;;  %v2025_v39 = vpop.permute.xlu2 %2024 }
 0x599   : > { %v3094_v8 = vunpack.i.h.bf16 %v3092_v62  ;;  %v3093_v29 = vunpack.i.l.bf16 %v3092_v62  ;;  %1970 = vmatpush.msrb.mxu0 %v1727_v15  ;;  %v4923_v15 = vld [vmem:[#allocation3_spill] sm:$0xff] }
 0x59a   : > { %1945 = vmatpush.msra.mxu2 %v1789_v48  ;;  %v1720_v37 = vsel %vm556_vm9, %v4916_v18, %v3108_v14  ;;  %v2009_v48 = vld [vmem:[#allocation2 + $0x10] sm:$0xff] }
 0x59b   : > { %v1723_v1 = vsel %vm556_vm9, %v4914_v24, %v3093_v29  ;;  %v1724_v40 = vsel %vm556_vm9, %v3093_v29, %v3094_v8  ;;  %v2015_v8 = vld [vmem:[#allocation2 + $0x60] sm:$0xff]  ;;  %v2016_v29 = vld [vmem:[#allocation2 + $0x68] sm:$0xff] }
 0x59c   : > { %1946 = vmatpush.msra.mxu2 %v1786_v49  ;;  %1931 = vmatpush.msra.mxu1 %v1723_v1 }
 0x59d   : > { %1971 = vmatpush.msrb.mxu0 %v1724_v40 }
 0x59e   : > { %1947 = vmatpush.msra.mxu2 %v1783_v3  ;;  %1932 = vmatpush.msra.mxu1 %v1720_v37 }
 0x59f   : > { %1972 = vmatpush.msrb.mxu0 %v1721_v32 }
 0x5a0   : > { %1948 = vmatpush.msra.mxu2 %v1780_v44  ;;  %v3112_v13 = vpop.permute.xlu1 %3111  ;;  %1933 = vmatpush.msra.mxu1 %v1717_v54 }
 0x5a1   : > { %v3114_v61 = vunpack.i.h.bf16 %v3112_v13  ;;  %v3113_v7 = vunpack.i.l.bf16 %v3112_v13  ;;  %1973 = vmatpush.msrb.mxu0 %v1718_v19 }
 0x5a2   : > { %1949 = vmatpush.msra.mxu2 %v4378_v34  ;;  %1934 = vmatpush.msra.mxu1 %v1714_v0  ;;  %v4921_v34 = vunpack.i.l.bf16 %v4621_v26 }
 0x5a3   : > { %1974 = vmatpush.msrb.mxu0 %v1715_v43  ;;  %1935 = vmatmul.f32.vlgmr.msra.gmra.mxu1 %v4575_v28  ;;  %v1763_v57 = vsel %vm556_vm9, %v3113_v7, %v3114_v61 }
 0x5a4   : > { %1950 = vmatpush.msra.mxu2 %v1774_v53  ;;  %1975 = vmatmul.f32.vlgmr.msrb.gmra.mxu0 %v4575_v28  ;;  %v1765_v47 = vsel %vm556_vm9, %v3089_v9, %v4921_v34  ;;  %v1762_v28 = vsel %vm556_vm9, %v3004_v20, %v3113_v7  ;;  %v2008_v9 = vld [vmem:[#allocation2 + $0x8] sm:$0xff]  ;;  %v2020_v20 = vld [vmem:[%s4834_s8] sm:$0xff] }
 0x5a5   : > { %1994 = vmatpush.msra.mxu3 %v1763_v57 }
 0x5a6   : > { %1951 = vmatpush.msra.mxu2 %v1771_v11  ;;  %2167 = vmatmul.msk.f32.vlgmr.msra.gmra.mxu3 %vm1875_vm12, %v4724_v60 }
 0x5a8   : > { %1952 = vmatpush.msra.mxu2 %v4363_v31  ;;  %v1495_v27 = vpop.permute.xlu1 %1494 }
 0x5aa   : > { %1953 = vmatpush.msra.mxu2 %v1765_v47 }
 0x5ac   : > { %1954 = vmatpush.msra.mxu2 %v1762_v28 }
 0x5ad   : > { %2166 = vmatmul.msk.f32.vlgmr.msra.gmra.mxu2 %vm1875_vm12, %v4724_v60 }
 0x5ea   : > { %v1896_v16 = vpop.f32.mrf.mxu3 }
 0x5eb   : > { %v1897_v2 = vadd.f32 %v1896_v16, %v1495_v27 }
 0x61a   : > { %v1916_v5 = vpop.f32.mrf.mxu2 }
 0x61b   : > { %v1917_v31 = vadd.f32 %v1916_v5, %v1897_v2 }
 0x61d   : > { %v1999_v22 = vmax.f32 %v1917_v31, 0.0 }
 0x61f   : > { %v2002_v26 = vmul.f32 %v1999_v22, %v3549_v6 }
 0x620   : > { %v1936_v36 = vpop.f32.mrf.mxu1 }
 0x621   : > { %2043 = vmatpush.msrb.mxu2 %v2002_v26  ;;  %v1976_v56 = vpop.f32.mrf.mxu0  ;;  %v1937_v46 = vadd.f32 %v1936_v36, %v1495_v27 }
 0x622   : > { %v1977_v59 = vadd.f32 %v1976_v56, %v1495_v27 }
 0x623   : > { %2044 = vmatpush.msrb.mxu2 %v2014_v35 }
 0x625   : > { %2045 = vmatpush.msrb.mxu2 %v2011_v50 }
 0x627   : > { %2046 = vmatpush.msrb.mxu2 %v2008_v9 }
 0x628   : > { %2168 = vmatmul.msk.f32.vlgmr.msrb.gmra.mxu2 %vm2027_vm13, %v2020_v20 }
 0x629   : > { %v1996_v60 = vpop.f32.mrf.mxu3 }
 0x62a   : > { %v1997_v38 = vadd.f32 %v1996_v60, %v1977_v59 }
 0x62c   : > { %v2001_v6 = vmax.f32 %v1997_v38, 0.0 }
 0x62e   : > { %v2004_v45 = vmul.f32 %v2001_v6, %v4922_v21 }
 0x630   : > { %2007 = vst.msk [vmem:[#allocation2 + $0x90] sm:$0xff] %vm364_vm0, %v2004_v45  ;;  %v1956_v17 = vpop.f32.mrf.mxu2 }
 0x631   : > { %v1957_v62 = vadd.f32 %v1956_v17, %v1937_v46 }
 0x633   : > { %v2000_v63 = vmax.f32 %v1957_v62, 0.0 }
 0x635   : > { %v2003_v25 = vmul.f32 %v2000_v63, %v4923_v15 }
 0x637   : > { %v2019_v14 = vld [vmem:[#allocation2 + $0x90] sm:$0xff]  ;;  %2063 = vmatpush.msrb.mxu1 %v2003_v25 }
 0x638   : > { %2083 = vmatpush.msra.mxu2 %v2019_v14 }
 0x639   : > { %2064 = vmatpush.msrb.mxu1 %v2015_v8 }
 0x63a   : > { %2084 = vmatpush.msra.mxu2 %v2016_v29 }
 0x63b   : > { %2065 = vmatpush.msrb.mxu1 %v2012_v10 }
 0x63c   : > { %2085 = vmatpush.msra.mxu2 %v2013_v52 }
 0x63d   : > { %2066 = vmatpush.msrb.mxu1 %v2009_v48 }
 0x63e   : > { %2086 = vmatpush.msra.mxu2 %v2010_v30  ;;  %2169 = vmatmul.msk.f32.vlgmr.msrb.gmra.mxu1 %vm2027_vm13, %v2020_v20 }
 0x63f   : > { %2170 = vmatmul.msk.f32.vlgmr.msra.gmra.mxu2 %vm2027_vm13, %v2020_v20 }
 0x6ab   : > { %v2048_v49 = vpop.f32.mrf.mxu2 }
 0x6ac   : > { %v2049_v24 = vadd.f32 %v2048_v49, %v2025_v39 }
 0x6ae   : > { %v2091_v1 = vadd.f32 %v2049_v24, %v2008_v9 }
 0x6b0   : > { %2094 = vst [vmem:[%s359_s18] sm:$0xff] %v2091_v1 }
 0x6bb   : > { %v2068_v40 = vpop.f32.mrf.mxu1 }
 0x6bc   : > { %v2069_v58 = vadd.f32 %v2068_v40, %v2025_v39 }
 0x6be   : > { %v2092_v41 = vadd.f32 %v2069_v58, %v2009_v48 }
 0x6c0   : > { %2095 = vst [vmem:[%s359_s18 + $0x8] sm:$0xff] %v2092_v41 }
 0x6c2   : > { %v2088_v55 = vpop.f32.mrf.mxu2 }
 0x6c3   : > { %v2089_v4 = vadd.f32 %v2088_v55, %v2025_v39 }
 0x6c5   : > { %v2093_v51 = vadd.f32 %v2089_v4, %v2010_v30 }
 0x6c7   : > { %2096 = vst.msk [vmem:[%s359_s18 + $0x10] sm:$0xff] %vm364_vm0, %v2093_v51 }
 0x6c8 PF: > { %s20_s13 = sadd.s32 1, %s3145_s13  }
 0x6c9   : > { %p17_p4 = scmp.ge.s32.totalorder %s20_s13, 4  }
 0x6cb   :  { %19 = sbr.rel (!%p17_p4) target bundleno = 1 (0x1), region = 90 }

</bundles_post_ra>
